<compile_context>
chip_gen: v6e
topology: v6e:2x2x1
jax: 0.10.0
libtpu: 0.0.40
codegen_flags: <defaults>
</compile_context>

<pallas_src>
import math
import functools

import jax
import jax.numpy as jnp
from jax import lax
from jax.experimental import pallas as pl
from jax.experimental.pallas import tpu as pltpu


# ----------------------------------------------------------------------------
# Pallas kernels
# ----------------------------------------------------------------------------
def encoder_stack_kernel(x_ref, mask_ref,
                         wqkv_ref, bqkv_ref, wo_ref, bo_ref,
                         ln1g_ref, ln1b_ref, ln2g_ref, ln2b_ref,
                         w1_ref, b1_ref, w2_ref, b2_ref,
                         o_ref, act_ref, *, num_heads):
    """Full nn.TransformerEncoder stack.  grid = (batch, layer).

    The running activation lives in the VMEM scratch `act_ref` across the layer
    ("arbitrary") axis; per-layer weights are streamed by BlockSpec pipelining.
    """
    layer = pl.program_id(1)

    @pl.when(layer == 0)
    def _():
        act_ref[...] = x_ref[0]                 # load fresh batch row at first layer

    x = act_ref[...]                            # (L, E) f32 — layer input
    L, E = x.shape
    D = E // num_heads
    scale = 1.0 / math.sqrt(D)
    mask = mask_ref[...]                        # (L, L) additive mask (0 / -1e9)

    # --- self attention ------------------------------------------------------
    xb = x.astype(jnp.bfloat16)
    qkv = jnp.dot(xb, wqkv_ref[0], preferred_element_type=jnp.float32) + bqkv_ref[0]
    q = qkv[:, 0 * E:1 * E]
    k = qkv[:, 1 * E:2 * E]
    v = qkv[:, 2 * E:3 * E]
    wo = wo_ref[0]                              # (E, E) bf16, [in, out]

    # per-head attention; output projection is accumulated per head so no lane-concat
    attn = jnp.zeros((L, E), jnp.float32)
    for h in range(num_heads):                  # static unroll
        qh = q[:, h * D:(h + 1) * D]
        kh = k[:, h * D:(h + 1) * D]
        vh = v[:, h * D:(h + 1) * D]
        s = lax.dot_general(qh, kh, (((1,), (1,)), ((), ())),
                            preferred_element_type=jnp.float32)     # (L, L)
        s = s * scale + mask
        s = s - jnp.max(s, axis=-1, keepdims=True)
        p = jnp.exp(s)
        p = p * pl.reciprocal(jnp.sum(p, axis=-1, keepdims=True), approx=True)
        ctx = jnp.dot(p, vh, preferred_element_type=jnp.float32)    # (L, D)
        attn = attn + jnp.dot(ctx.astype(jnp.bfloat16), wo[h * D:(h + 1) * D, :],
                              preferred_element_type=jnp.float32)
    attn = attn + bo_ref[0]

    # --- residual + LayerNorm1 ----------------------------------------------
    y = x + attn
    mu = jnp.mean(y, axis=-1, keepdims=True)
    var = jnp.mean((y - mu) ** 2, axis=-1, keepdims=True)
    y = (y - mu) * lax.rsqrt(var + 1e-5) * ln1g_ref[0] + ln1b_ref[0]

    # --- feed-forward (relu) -------------------------------------------------
    h1 = jnp.dot(y.astype(jnp.bfloat16), w1_ref[0],
                 preferred_element_type=jnp.float32) + b1_ref[0]
    h1 = jnp.maximum(h1, 0.0)
    h2 = jnp.dot(h1.astype(jnp.bfloat16), w2_ref[0],
                 preferred_element_type=jnp.float32) + b2_ref[0]

    # --- residual + LayerNorm2 ----------------------------------------------
    z = y + h2
    mu2 = jnp.mean(z, axis=-1, keepdims=True)
    var2 = jnp.mean((z - mu2) ** 2, axis=-1, keepdims=True)
    z = (z - mu2) * lax.rsqrt(var2 + 1e-5) * ln2g_ref[0] + ln2b_ref[0]

    act_ref[...] = z                            # stays VMEM-resident for next layer

    @pl.when(layer == pl.num_programs(1) - 1)
    def _():
        o_ref[0] = z                            # single HBM writeback per batch row


def classifier_kernel(x_ref, w1_ref, b1_ref, w2_ref, b2_ref, o_ref):
    """Linear(E,1024) -> ReLU -> Linear(1024, V_padded)."""
    x = x_ref[0]                                                     # (T, E) f32
    hid = jnp.dot(x.astype(jnp.bfloat16), w1_ref[...],
                  preferred_element_type=jnp.float32) + b1_ref[...]
    hid = jnp.maximum(hid, 0.0)
    o_ref[0] = jnp.dot(hid.astype(jnp.bfloat16), w2_ref[...],
                       preferred_element_type=jnp.float32) + b2_ref[...]


# ----------------------------------------------------------------------------
# Wrappers around pallas_call
# ----------------------------------------------------------------------------
def encoder_stack(x, mask, stacked, num_heads):
    B, L, E = x.shape
    names = ["wqkv", "bqkv", "wo", "bo", "ln1_g", "ln1_b", "ln2_g", "ln2_b",
             "w1", "b1", "w2", "b2"]
    weights = [stacked[n] for n in names]
    NL = weights[0].shape[0]

    def layer_spec(p):
        rest = p.shape[1:]
        return pl.BlockSpec((1,) + rest,
                            lambda b, l, _n=len(rest): (l,) + (0,) * _n)

    kernel = functools.partial(encoder_stack_kernel, num_heads=num_heads)
    return pl.pallas_call(
        kernel,
        out_shape=jax.ShapeDtypeStruct((B, L, E), jnp.float32),
        grid=(B, NL),
        in_specs=[pl.BlockSpec((1, L, E), lambda b, l: (b, 0, 0)),
                  pl.BlockSpec((L, L), lambda b, l: (0, 0))]
                 + [layer_spec(p) for p in weights],
        out_specs=pl.BlockSpec((1, L, E), lambda b, l: (b, 0, 0)),
        scratch_shapes=[pltpu.VMEM((L, E), jnp.float32)],
        compiler_params=pltpu.CompilerParams(
            dimension_semantics=("parallel", "arbitrary")),
    )(x, mask, *weights)


def classifier(x, cls):
    B, T, E = x.shape
    Vp = cls["w2"].shape[1]
    plist = [cls["w1"], cls["b1"], cls["w2"], cls["b2"]]
    return pl.pallas_call(
        classifier_kernel,
        out_shape=jax.ShapeDtypeStruct((B, T, Vp), jnp.float32),
        grid=(B,),
        in_specs=[pl.BlockSpec((1, T, E), lambda b: (b, 0, 0))]
                 + [pl.BlockSpec(p.shape, lambda b, _n=p.ndim: (0,) * _n)
                    for p in plist],
        out_specs=pl.BlockSpec((1, T, Vp), lambda b: (b, 0, 0)),
        compiler_params=pltpu.CompilerParams(dimension_semantics=("parallel",)),
    )(x, *plist)


# ----------------------------------------------------------------------------
# One-time weight repacking (transpose to [in,out], stack over layers, cast bf16)
# ----------------------------------------------------------------------------
def pack_params(params):
    layers = params["layers"]

    def stk(fn):
        return jnp.stack([fn(lp) for lp in layers], axis=0)

    stacked = {
        "wqkv": stk(lambda lp: lp["in_w"].T.astype(jnp.bfloat16)),    # (NL, E, 3E)
        "bqkv": stk(lambda lp: lp["in_b"]),                           # (NL, 1, 3E)
        "wo":   stk(lambda lp: lp["out_w"].T.astype(jnp.bfloat16)),   # (NL, E, E)
        "bo":   stk(lambda lp: lp["out_b"]),                          # (NL, 1, E)
        "ln1_g": stk(lambda lp: lp["ln1_g"]),
        "ln1_b": stk(lambda lp: lp["ln1_b"]),
        "ln2_g": stk(lambda lp: lp["ln2_g"]),
        "ln2_b": stk(lambda lp: lp["ln2_b"]),
        "w1":   stk(lambda lp: lp["ff1_w"].T.astype(jnp.bfloat16)),   # (NL, E, F)
        "b1":   stk(lambda lp: lp["ff1_b"]),                          # (NL, 1, F)
        "w2":   stk(lambda lp: lp["ff2_w"].T.astype(jnp.bfloat16)),   # (NL, F, E)
        "b2":   stk(lambda lp: lp["ff2_b"]),                          # (NL, 1, E)
    }

    cp = params["cls"]
    V = cp["w2"].shape[0]
    Vp = ((V + 127) // 128) * 128            # lane-dense classifier output (pad vocab)
    w2_t = cp["w2"].T                         # (1024, V)
    w2_p = jnp.zeros((w2_t.shape[0], Vp), jnp.float32).at[:, :V].set(w2_t)
    b2_p = jnp.zeros((1, Vp), jnp.float32).at[:, :V].set(cp["b2"])
    cls = {
        "w1": cp["w1"].T.astype(jnp.bfloat16),    # (E, 1024)
        "b1": cp["b1"],                           # (1, 1024) f32
        "w2": w2_p.astype(jnp.bfloat16),          # (1024, Vp)
        "b2": b2_p,                               # (1, Vp) f32
    }
    return stacked, cls, V


# ----------------------------------------------------------------------------
# Glue (plain JAX): embedding, positional encoding, mask construction
# ----------------------------------------------------------------------------
def positional_encoding(x):
    B, L, E = x.shape
    pos = jnp.arange(L, dtype=jnp.float32)
    enc = jnp.exp(-math.log(10000.0) *
                  (jnp.arange(0, E, 2, dtype=jnp.float32) / E))
    prod = jnp.outer(pos, enc)                 # (L, E//2)
    pe = jnp.zeros((L, E), jnp.float32)
    pe = pe.at[:, 0::2].set(jnp.sin(prod))
    pe = pe.at[:, 1::2].set(jnp.cos(prod))
    return x + pe[None, :, :]


def build_causal_mask(src_len, trg_len):
    # large finite negative instead of -inf (robust: no (-inf)-(-inf)=NaN in softmax)
    L = src_len + trg_len
    neg = jnp.float32(-1e9)
    left = jnp.zeros((L, src_len), jnp.float32)
    top_right = jnp.full((src_len, trg_len), neg, jnp.float32)
    i = jnp.arange(trg_len)[:, None]
    j = jnp.arange(trg_len)[None, :]
    bot_right = jnp.where(j > i, neg, 0.0).astype(jnp.float32)
    right = jnp.concatenate([top_right, bot_right], axis=0)
    return jnp.concatenate([left, right], axis=1)


# ----------------------------------------------------------------------------
# Parameter construction (deterministic, synthetic, PyTorch-style [out,in])
# ----------------------------------------------------------------------------
def init_params(key, src_vocab, trg_vocab, embed_dim, num_layers,
                ffn_dim=2048, cls_hidden=1024):
    keys = jax.random.split(key, 4 + num_layers)
    params = {
        "src_emb": 0.02 * jax.random.normal(keys[0], (src_vocab, embed_dim), jnp.float32),
        # note: trg embedding also uses src_vocab_size, matching the PyTorch module
        "trg_emb": 0.02 * jax.random.normal(keys[1], (src_vocab, embed_dim), jnp.float32),
        "layers": [],
        "cls": {
            "w1": 0.02 * jax.random.normal(keys[2], (cls_hidden, embed_dim), jnp.float32),
            "b1": jnp.zeros((1, cls_hidden), jnp.float32),
            "w2": 0.02 * jax.random.normal(keys[3], (trg_vocab, cls_hidden), jnp.float32),
            "b2": jnp.zeros((1, trg_vocab), jnp.float32),
        },
    }
    for l in range(num_layers):
        lk = jax.random.split(keys[4 + l], 4)
        params["layers"].append({
            "in_w": 0.02 * jax.random.normal(lk[0], (3 * embed_dim, embed_dim), jnp.float32),
            "in_b": jnp.zeros((1, 3 * embed_dim), jnp.float32),
            "out_w": 0.02 * jax.random.normal(lk[1], (embed_dim, embed_dim), jnp.float32),
            "out_b": jnp.zeros((1, embed_dim), jnp.float32),
            "ln1_g": jnp.ones((1, embed_dim), jnp.float32),
            "ln1_b": jnp.zeros((1, embed_dim), jnp.float32),
            "ln2_g": jnp.ones((1, embed_dim), jnp.float32),
            "ln2_b": jnp.zeros((1, embed_dim), jnp.float32),
            "ff1_w": 0.02 * jax.random.normal(lk[2], (ffn_dim, embed_dim), jnp.float32),
            "ff1_b": jnp.zeros((1, ffn_dim), jnp.float32),
            "ff2_w": 0.02 * jax.random.normal(lk[3], (embed_dim, ffn_dim), jnp.float32),
            "ff2_b": jnp.zeros((1, embed_dim), jnp.float32),
        })
    return params


# ----------------------------------------------------------------------------
# Full forward pass (Pallas kernels for the hot path)
# ----------------------------------------------------------------------------
def decoder_transformer_forward(params, src_seq, trg_seq, num_heads):
    src_len = src_seq.shape[1]
    trg_len = trg_seq.shape[1]

    src_e = positional_encoding(jnp.take(params["src_emb"], src_seq, axis=0))
    trg_e = positional_encoding(jnp.take(params["trg_emb"], trg_seq, axis=0))
    seq = jnp.concatenate([src_e, trg_e], axis=1)            # (B, S+T, E)

    mask = build_causal_mask(src_len, trg_len)                # (S+T, S+T)
    stacked, cls, V = pack_params(params)                     # one-time repack (folds under jit)

    x = encoder_stack(seq, mask, stacked, num_heads)          # single fused pallas_call
    trg_out = x[:, src_len:, :]                               # (B, T, E)
    logits = classifier(trg_out, cls)                         # (B, T, Vp)
    return logits[:, :, :V]                                   # strip vocab padding


# ----------------------------------------------------------------------------
# Pure-JAX f32 reference (same math) for a correctness check
# ----------------------------------------------------------------------------
def _ref_forward(params, src_seq, trg_seq, num_heads):
    src_len = src_seq.shape[1]
    src_e = positional_encoding(jnp.take(params["src_emb"], src_seq, axis=0))
    trg_e = positional_encoding(jnp.take(params["trg_emb"], trg_seq, axis=0))
    x = jnp.concatenate([src_e, trg_e], axis=1)
    mask = build_causal_mask(src_len, trg_seq.shape[1])
    E = x.shape[-1]
    D = E // num_heads
    for lp in params["layers"]:
        qkv = x @ lp["in_w"].T + lp["in_b"]
        q, k, v = qkv[..., :E], qkv[..., E:2 * E], qkv[..., 2 * E:]
        outs = []
        for h in range(num_heads):
            qh = q[..., h * D:(h + 1) * D] / math.sqrt(D)
            kh = k[..., h * D:(h + 1) * D]
            vh = v[..., h * D:(h + 1) * D]
            s = jnp.einsum("bqd,bkd->bqk", qh, kh) + mask[None]
            p = jax.nn.softmax(s, axis=-1)
            outs.append(jnp.einsum("bqk,bkd->bqd", p, vh))
        attn = jnp.concatenate(outs, axis=-1) @ lp["out_w"].T + lp["out_b"]
        y = x + attn
        mu = y.mean(-1, keepdims=True)
        var = ((y - mu) ** 2).mean(-1, keepdims=True)
        y = (y - mu) / jnp.sqrt(var + 1e-5) * lp["ln1_g"] + lp["ln1_b"]
        h1 = jnp.maximum(y @ lp["ff1_w"].T + lp["ff1_b"], 0.0)
        z = y + h1 @ lp["ff2_w"].T + lp["ff2_b"]
        mu = z.mean(-1, keepdims=True)
        var = ((z - mu) ** 2).mean(-1, keepdims=True)
        x = (z - mu) / jnp.sqrt(var + 1e-5) * lp["ln2_g"] + lp["ln2_b"]
    t = x[:, src_len:, :]
    cp = params["cls"]
    h = jnp.maximum(t @ cp["w1"].T + cp["b1"], 0.0)
    return h @ cp["w2"].T + cp["b2"]


# ----------------------------------------------------------------------------
if __name__ == "__main__":
    batch = 2
    src_vocab_size = 16
    trg_vocab_size = 12
    embed_dim = 32
    num_layers = 2
    num_heads = 4
    src_len = 8
    trg_len = 8

    key = jax.random.PRNGKey(0)
    pkey, skey, tkey = jax.random.split(key, 3)
    params = init_params(pkey, src_vocab_size, trg_vocab_size, embed_dim, num_layers)

    src_seq = jax.random.randint(skey, (batch, src_len), 0, src_vocab_size, dtype=jnp.int32)
    trg_seq = jax.random.randint(tkey, (batch, trg_len), 0, src_vocab_size, dtype=jnp.int32)

    fwd = jax.jit(functools.partial(decoder_transformer_forward, num_heads=num_heads))
    out = jax.block_until_ready(fwd(params, src_seq, trg_seq))

    ref = _ref_forward(params, src_seq, trg_seq, num_heads)
    assert out.shape == (batch, trg_len, trg_vocab_size)
    max_err = float(jnp.max(jnp.abs(out - ref)))
    # bf16 MXU inputs + approx reciprocal => loose tolerance vs pure-f32 reference
    assert jnp.allclose(out, ref, rtol=2e-2, atol=2e-2), f"mismatch vs reference (max err {max_err})"

    # TODO(synk): dropout (p=0.1) inside TransformerEncoderLayer is omitted (eval-mode semantics).
    print("KERNEL_OK")
</pallas_src>

<mosaic_0001>
module attributes {stable_mosaic.version = 11 : i64} {
  func.func @encoder_stack_kernel(%arg0: i32, %arg1: i32, %arg2: memref<1x16x32xf32, #tpu.memory_space<vmem>>, %arg3: memref<16x16xf32, #tpu.memory_space<vmem>>, %arg4: memref<1x32x96xbf16, #tpu.memory_space<vmem>>, %arg5: memref<1x1x96xf32, #tpu.memory_space<vmem>>, %arg6: memref<1x32x32xbf16, #tpu.memory_space<vmem>>, %arg7: memref<1x1x32xf32, #tpu.memory_space<vmem>>, %arg8: memref<1x1x32xf32, #tpu.memory_space<vmem>>, %arg9: memref<1x1x32xf32, #tpu.memory_space<vmem>>, %arg10: memref<1x1x32xf32, #tpu.memory_space<vmem>>, %arg11: memref<1x1x32xf32, #tpu.memory_space<vmem>>, %arg12: memref<1x32x2048xbf16, #tpu.memory_space<vmem>>, %arg13: memref<1x1x2048xf32, #tpu.memory_space<vmem>>, %arg14: memref<1x2048x32xbf16, #tpu.memory_space<vmem>>, %arg15: memref<1x1x32xf32, #tpu.memory_space<vmem>>, %arg16: memref<1x16x32xf32, #tpu.memory_space<vmem>>, %arg17: memref<16x32xf32, #tpu.memory_space<vmem>>) attributes {dimension_semantics = [#tpu.dimension_semantics<parallel>, #tpu.dimension_semantics<arbitrary>], iteration_bounds = array<i64: 2, 2>, scalar_prefetch = 0 : i64, scratch_operands = 1 : i64, tpu.core_type = #tpu.core_type<tc>, window_params = [{transform_indices = @transform_0, window_bounds = array<i64: 1, 16, 32>}, {pipeline_mode = #tpu.pipeline_mode<synchronous>, transform_indices = @transform_1, window_bounds = array<i64: 16, 16>}, {transform_indices = @transform_2, window_bounds = array<i64: 1, 32, 96>}, {transform_indices = @transform_3, window_bounds = array<i64: 1, 1, 96>}, {transform_indices = @transform_4, window_bounds = array<i64: 1, 32, 32>}, {transform_indices = @transform_5, window_bounds = array<i64: 1, 1, 32>}, {transform_indices = @transform_6, window_bounds = array<i64: 1, 1, 32>}, {transform_indices = @transform_7, window_bounds = array<i64: 1, 1, 32>}, {transform_indices = @transform_8, window_bounds = array<i64: 1, 1, 32>}, {transform_indices = @transform_9, window_bounds = array<i64: 1, 1, 32>}, {transform_indices = @transform_10, window_bounds = array<i64: 1, 32, 2048>}, {transform_indices = @transform_11, window_bounds = array<i64: 1, 1, 2048>}, {transform_indices = @transform_12, window_bounds = array<i64: 1, 2048, 32>}, {transform_indices = @transform_13, window_bounds = array<i64: 1, 1, 32>}, {transform_indices = @transform_14, window_bounds = array<i64: 1, 16, 32>}]} {
    %c0_i32 = arith.constant 0 : i32
    %0 = arith.cmpi eq, %arg1, %c0_i32 : i32
    %1 = arith.extui %0 : i1 to i32
    %c0_i32_0 = arith.constant 0 : i32
    %2 = arith.cmpi ne, %1, %c0_i32_0 : i32
    scf.if %2 {
      %c0_81 = arith.constant 0 : index
      %c0_82 = arith.constant 0 : index
      %c0_83 = arith.constant 0 : index
      %187 = vector.load %arg2[%c0_81, %c0_82, %c0_83] : memref<1x16x32xf32, #tpu.memory_space<vmem>>, vector<1x16x32xf32>
      %188 = vector.shape_cast %187 : vector<1x16x32xf32> to vector<16x32xf32>
      %c0_84 = arith.constant 0 : index
      %c0_85 = arith.constant 0 : index
      %189 = vector.load %arg17[%c0_84, %c0_85] : memref<16x32xf32, #tpu.memory_space<vmem>>, vector<16x32xf32>
      tpu.vector_store %arg17[%c0_84, %c0_85], %188 {strides = array<i32>} : memref<16x32xf32, #tpu.memory_space<vmem>>, vector<16x32xf32>,
    } else {
    }
    %c0 = arith.constant 0 : index
    %c0_1 = arith.constant 0 : index
    %3 = vector.load %arg17[%c0, %c0_1] : memref<16x32xf32, #tpu.memory_space<vmem>>, vector<16x32xf32>
    %c0_2 = arith.constant 0 : index
    %c0_3 = arith.constant 0 : index
    %4 = vector.load %arg3[%c0_2, %c0_3] : memref<16x16xf32, #tpu.memory_space<vmem>>, vector<16x16xf32>
    %5 = arith.truncf %3 : vector<16x32xf32> to vector<16x32xbf16>
    %c0_4 = arith.constant 0 : index
    %c0_5 = arith.constant 0 : index
    %c0_6 = arith.constant 0 : index
    %6 = vector.load %arg4[%c0_4, %c0_5, %c0_6] : memref<1x32x96xbf16, #tpu.memory_space<vmem>>, vector<1x32x96xbf16>
    %7 = vector.shape_cast %6 : vector<1x32x96xbf16> to vector<32x96xbf16>
    %cst = arith.constant dense<0.000000e+00> : vector<16x96xf32>
    %8 = tpu.matmul %5, %7, %cst {dimension_numbers = #tpu.dot_dimension_numbers<[1], [0], [0], [1], [0, 0, 1, 1], [], []>} : vector<16x32xbf16>, vector<32x96xbf16>, vector<16x96xf32> -> vector<16x96xf32>
    %c0_7 = arith.constant 0 : index
    %c0_8 = arith.constant 0 : index
    %c0_9 = arith.constant 0 : index
    %9 = vector.load %arg5[%c0_7, %c0_8, %c0_9] : memref<1x1x96xf32, #tpu.memory_space<vmem>>, vector<1x1x96xf32>
    %10 = vector.shape_cast %9 : vector<1x1x96xf32> to vector<1x96xf32>
    %11 = vector.broadcast %10 : vector<1x96xf32> to vector<16x96xf32>
    %12 = arith.addf %8, %11 : vector<16x96xf32>
    %13 = vector.extract_strided_slice %12 {offsets = [0, 0], sizes = [16, 32], strides = [1, 1]} : vector<16x96xf32> to vector<16x32xf32>
    %14 = vector.extract_strided_slice %12 {offsets = [0, 32], sizes = [16, 32], strides = [1, 1]} : vector<16x96xf32> to vector<16x32xf32>
    %15 = vector.extract_strided_slice %12 {offsets = [0, 64], sizes = [16, 32], strides = [1, 1]} : vector<16x96xf32> to vector<16x32xf32>
    %c0_10 = arith.constant 0 : index
    %c0_11 = arith.constant 0 : index
    %c0_12 = arith.constant 0 : index
    %16 = vector.load %arg6[%c0_10, %c0_11, %c0_12] : memref<1x32x32xbf16, #tpu.memory_space<vmem>>, vector<1x32x32xbf16>
    %17 = vector.shape_cast %16 : vector<1x32x32xbf16> to vector<32x32xbf16>
    %cst_13 = arith.constant 0.000000e+00 : f32
    %18 = vector.broadcast %cst_13 : f32 to vector<16x32xf32>
    %19 = vector.extract_strided_slice %13 {offsets = [0, 0], sizes = [16, 8], strides = [1, 1]} : vector<16x32xf32> to vector<16x8xf32>
    %20 = vector.extract_strided_slice %14 {offsets = [0, 0], sizes = [16, 8], strides = [1, 1]} : vector<16x32xf32> to vector<16x8xf32>
    %21 = vector.extract_strided_slice %15 {offsets = [0, 0], sizes = [16, 8], strides = [1, 1]} : vector<16x32xf32> to vector<16x8xf32>
    %cst_14 = arith.constant dense<0.000000e+00> : vector<16x16xf32>
    %22 = tpu.matmul %19, %20, %cst_14 {dimension_numbers = #tpu.dot_dimension_numbers<[1], [1], [0], [0], [0, 0, 1, 0], [], []>} : vector<16x8xf32>, vector<16x8xf32>, vector<16x16xf32> -> vector<16x16xf32>
    %cst_15 = arith.constant 0.353553385 : f32
    %23 = vector.broadcast %cst_15 : f32 to vector<16x16xf32>
    %24 = arith.mulf %22, %23 : vector<16x16xf32>
    %25 = arith.addf %24, %4 : vector<16x16xf32>
    %cst_16 = arith.constant dense<0xFF800000> : vector<16xf32>
    %26 = vector.multi_reduction <maximumf>, %25, %cst_16 [1] : vector<16x16xf32> to vector<16xf32>
    %27 = vector.shape_cast %26 : vector<16xf32> to vector<16x1xf32>
    %28 = vector.broadcast %27 : vector<16x1xf32> to vector<16x16xf32>
    %29 = arith.subf %25, %28 : vector<16x16xf32>
    %30 = math.exp %29 : vector<16x16xf32>
    %cst_17 = arith.constant dense<0.000000e+00> : vector<16xf32>
    %31 = vector.multi_reduction <add>, %30, %cst_17 [1] : vector<16x16xf32> to vector<16xf32>
    %32 = vector.shape_cast %31 : vector<16xf32> to vector<16x1xf32>
    %33 = tpu.reciprocal %32 {approx = true} : vector<16x1xf32> -> vector<16x1xf32>
    %34 = vector.broadcast %33 : vector<16x1xf32> to vector<16x16xf32>
    %35 = arith.mulf %30, %34 : vector<16x16xf32>
    %cst_18 = arith.constant dense<0.000000e+00> : vector<16x8xf32>
    %36 = tpu.matmul %35, %21, %cst_18 {dimension_numbers = #tpu.dot_dimension_numbers<[1], [0], [0], [1], [0, 0, 1, 1], [], []>} : vector<16x16xf32>, vector<16x8xf32>, vector<16x8xf32> -> vector<16x8xf32>
    %37 = arith.truncf %36 : vector<16x8xf32> to vector<16x8xbf16>
    %38 = vector.extract_strided_slice %17 {offsets = [0, 0], sizes = [8, 32], strides = [1, 1]} : vector<32x32xbf16> to vector<8x32xbf16>
    %cst_19 = arith.constant dense<0.000000e+00> : vector<16x32xf32>
    %39 = tpu.matmul %37, %38, %cst_19 {dimension_numbers = #tpu.dot_dimension_numbers<[1], [0], [0], [1], [0, 0, 1, 1], [], []>} : vector<16x8xbf16>, vector<8x32xbf16>, vector<16x32xf32> -> vector<16x32xf32>
    %40 = arith.addf %18, %39 : vector<16x32xf32>
    %41 = vector.extract_strided_slice %13 {offsets = [0, 8], sizes = [16, 8], strides = [1, 1]} : vector<16x32xf32> to vector<16x8xf32>
    %42 = vector.extract_strided_slice %14 {offsets = [0, 8], sizes = [16, 8], strides = [1, 1]} : vector<16x32xf32> to vector<16x8xf32>
    %43 = vector.extract_strided_slice %15 {offsets = [0, 8], sizes = [16, 8], strides = [1, 1]} : vector<16x32xf32> to vector<16x8xf32>
    %cst_20 = arith.constant dense<0.000000e+00> : vector<16x16xf32>
    %44 = tpu.matmul %41, %42, %cst_20 {dimension_numbers = #tpu.dot_dimension_numbers<[1], [1], [0], [0], [0, 0, 1, 0], [], []>} : vector<16x8xf32>, vector<16x8xf32>, vector<16x16xf32> -> vector<16x16xf32>
    %cst_21 = arith.constant 0.353553385 : f32
    %45 = vector.broadcast %cst_21 : f32 to vector<16x16xf32>
    %46 = arith.mulf %44, %45 : vector<16x16xf32>
    %47 = arith.addf %46, %4 : vector<16x16xf32>
    %cst_22 = arith.constant dense<0xFF800000> : vector<16xf32>
    %48 = vector.multi_reduction <maximumf>, %47, %cst_22 [1] : vector<16x16xf32> to vector<16xf32>
    %49 = vector.shape_cast %48 : vector<16xf32> to vector<16x1xf32>
    %50 = vector.broadcast %49 : vector<16x1xf32> to vector<16x16xf32>
    %51 = arith.subf %47, %50 : vector<16x16xf32>
    %52 = math.exp %51 : vector<16x16xf32>
    %cst_23 = arith.constant dense<0.000000e+00> : vector<16xf32>
    %53 = vector.multi_reduction <add>, %52, %cst_23 [1] : vector<16x16xf32> to vector<16xf32>
    %54 = vector.shape_cast %53 : vector<16xf32> to vector<16x1xf32>
    %55 = tpu.reciprocal %54 {approx = true} : vector<16x1xf32> -> vector<16x1xf32>
    %56 = vector.broadcast %55 : vector<16x1xf32> to vector<16x16xf32>
    %57 = arith.mulf %52, %56 : vector<16x16xf32>
    %cst_24 = arith.constant dense<0.000000e+00> : vector<16x8xf32>
    %58 = tpu.matmul %57, %43, %cst_24 {dimension_numbers = #tpu.dot_dimension_numbers<[1], [0], [0], [1], [0, 0, 1, 1], [], []>} : vector<16x16xf32>, vector<16x8xf32>, vector<16x8xf32> -> vector<16x8xf32>
    %59 = arith.truncf %58 : vector<16x8xf32> to vector<16x8xbf16>
    %60 = vector.extract_strided_slice %17 {offsets = [8, 0], sizes = [8, 32], strides = [1, 1]} : vector<32x32xbf16> to vector<8x32xbf16>
    %cst_25 = arith.constant dense<0.000000e+00> : vector<16x32xf32>
    %61 = tpu.matmul %59, %60, %cst_25 {dimension_numbers = #tpu.dot_dimension_numbers<[1], [0], [0], [1], [0, 0, 1, 1], [], []>} : vector<16x8xbf16>, vector<8x32xbf16>, vector<16x32xf32> -> vector<16x32xf32>
    %62 = arith.addf %40, %61 : vector<16x32xf32>
    %63 = vector.extract_strided_slice %13 {offsets = [0, 16], sizes = [16, 8], strides = [1, 1]} : vector<16x32xf32> to vector<16x8xf32>
    %64 = vector.extract_strided_slice %14 {offsets = [0, 16], sizes = [16, 8], strides = [1, 1]} : vector<16x32xf32> to vector<16x8xf32>
    %65 = vector.extract_strided_slice %15 {offsets = [0, 16], sizes = [16, 8], strides = [1, 1]} : vector<16x32xf32> to vector<16x8xf32>
    %cst_26 = arith.constant dense<0.000000e+00> : vector<16x16xf32>
    %66 = tpu.matmul %63, %64, %cst_26 {dimension_numbers = #tpu.dot_dimension_numbers<[1], [1], [0], [0], [0, 0, 1, 0], [], []>} : vector<16x8xf32>, vector<16x8xf32>, vector<16x16xf32> -> vector<16x16xf32>
    %cst_27 = arith.constant 0.353553385 : f32
    %67 = vector.broadcast %cst_27 : f32 to vector<16x16xf32>
    %68 = arith.mulf %66, %67 : vector<16x16xf32>
    %69 = arith.addf %68, %4 : vector<16x16xf32>
    %cst_28 = arith.constant dense<0xFF800000> : vector<16xf32>
    %70 = vector.multi_reduction <maximumf>, %69, %cst_28 [1] : vector<16x16xf32> to vector<16xf32>
    %71 = vector.shape_cast %70 : vector<16xf32> to vector<16x1xf32>
    %72 = vector.broadcast %71 : vector<16x1xf32> to vector<16x16xf32>
    %73 = arith.subf %69, %72 : vector<16x16xf32>
    %74 = math.exp %73 : vector<16x16xf32>
    %cst_29 = arith.constant dense<0.000000e+00> : vector<16xf32>
    %75 = vector.multi_reduction <add>, %74, %cst_29 [1] : vector<16x16xf32> to vector<16xf32>
    %76 = vector.shape_cast %75 : vector<16xf32> to vector<16x1xf32>
    %77 = tpu.reciprocal %76 {approx = true} : vector<16x1xf32> -> vector<16x1xf32>
    %78 = vector.broadcast %77 : vector<16x1xf32> to vector<16x16xf32>
    %79 = arith.mulf %74, %78 : vector<16x16xf32>
    %cst_30 = arith.constant dense<0.000000e+00> : vector<16x8xf32>
    %80 = tpu.matmul %79, %65, %cst_30 {dimension_numbers = #tpu.dot_dimension_numbers<[1], [0], [0], [1], [0, 0, 1, 1], [], []>} : vector<16x16xf32>, vector<16x8xf32>, vector<16x8xf32> -> vector<16x8xf32>
    %81 = arith.truncf %80 : vector<16x8xf32> to vector<16x8xbf16>
    %82 = vector.extract_strided_slice %17 {offsets = [16, 0], sizes = [8, 32], strides = [1, 1]} : vector<32x32xbf16> to vector<8x32xbf16>
    %cst_31 = arith.constant dense<0.000000e+00> : vector<16x32xf32>
    %83 = tpu.matmul %81, %82, %cst_31 {dimension_numbers = #tpu.dot_dimension_numbers<[1], [0], [0], [1], [0, 0, 1, 1], [], []>} : vector<16x8xbf16>, vector<8x32xbf16>, vector<16x32xf32> -> vector<16x32xf32>
    %84 = arith.addf %62, %83 : vector<16x32xf32>
    %85 = vector.extract_strided_slice %13 {offsets = [0, 24], sizes = [16, 8], strides = [1, 1]} : vector<16x32xf32> to vector<16x8xf32>
    %86 = vector.extract_strided_slice %14 {offsets = [0, 24], sizes = [16, 8], strides = [1, 1]} : vector<16x32xf32> to vector<16x8xf32>
    %87 = vector.extract_strided_slice %15 {offsets = [0, 24], sizes = [16, 8], strides = [1, 1]} : vector<16x32xf32> to vector<16x8xf32>
    %cst_32 = arith.constant dense<0.000000e+00> : vector<16x16xf32>
    %88 = tpu.matmul %85, %86, %cst_32 {dimension_numbers = #tpu.dot_dimension_numbers<[1], [1], [0], [0], [0, 0, 1, 0], [], []>} : vector<16x8xf32>, vector<16x8xf32>, vector<16x16xf32> -> vector<16x16xf32>
    %cst_33 = arith.constant 0.353553385 : f32
    %89 = vector.broadcast %cst_33 : f32 to vector<16x16xf32>
    %90 = arith.mulf %88, %89 : vector<16x16xf32>
    %91 = arith.addf %90, %4 : vector<16x16xf32>
    %cst_34 = arith.constant dense<0xFF800000> : vector<16xf32>
    %92 = vector.multi_reduction <maximumf>, %91, %cst_34 [1] : vector<16x16xf32> to vector<16xf32>
    %93 = vector.shape_cast %92 : vector<16xf32> to vector<16x1xf32>
    %94 = vector.broadcast %93 : vector<16x1xf32> to vector<16x16xf32>
    %95 = arith.subf %91, %94 : vector<16x16xf32>
    %96 = math.exp %95 : vector<16x16xf32>
    %cst_35 = arith.constant dense<0.000000e+00> : vector<16xf32>
    %97 = vector.multi_reduction <add>, %96, %cst_35 [1] : vector<16x16xf32> to vector<16xf32>
    %98 = vector.shape_cast %97 : vector<16xf32> to vector<16x1xf32>
    %99 = tpu.reciprocal %98 {approx = true} : vector<16x1xf32> -> vector<16x1xf32>
    %100 = vector.broadcast %99 : vector<16x1xf32> to vector<16x16xf32>
    %101 = arith.mulf %96, %100 : vector<16x16xf32>
    %cst_36 = arith.constant dense<0.000000e+00> : vector<16x8xf32>
    %102 = tpu.matmul %101, %87, %cst_36 {dimension_numbers = #tpu.dot_dimension_numbers<[1], [0], [0], [1], [0, 0, 1, 1], [], []>} : vector<16x16xf32>, vector<16x8xf32>, vector<16x8xf32> -> vector<16x8xf32>
    %103 = arith.truncf %102 : vector<16x8xf32> to vector<16x8xbf16>
    %104 = vector.extract_strided_slice %17 {offsets = [24, 0], sizes = [8, 32], strides = [1, 1]} : vector<32x32xbf16> to vector<8x32xbf16>
    %cst_37 = arith.constant dense<0.000000e+00> : vector<16x32xf32>
    %105 = tpu.matmul %103, %104, %cst_37 {dimension_numbers = #tpu.dot_dimension_numbers<[1], [0], [0], [1], [0, 0, 1, 1], [], []>} : vector<16x8xbf16>, vector<8x32xbf16>, vector<16x32xf32> -> vector<16x32xf32>
    %106 = arith.addf %84, %105 : vector<16x32xf32>
    %c0_38 = arith.constant 0 : index
    %c0_39 = arith.constant 0 : index
    %c0_40 = arith.constant 0 : index
    %107 = vector.load %arg7[%c0_38, %c0_39, %c0_40] : memref<1x1x32xf32, #tpu.memory_space<vmem>>, vector<1x1x32xf32>
    %108 = vector.shape_cast %107 : vector<1x1x32xf32> to vector<1x32xf32>
    %109 = vector.broadcast %108 : vector<1x32xf32> to vector<16x32xf32>
    %110 = arith.addf %106, %109 : vector<16x32xf32>
    %111 = arith.addf %3, %110 : vector<16x32xf32>
    %cst_41 = arith.constant dense<0.000000e+00> : vector<16xf32>
    %112 = vector.multi_reduction <add>, %111, %cst_41 [1] : vector<16x32xf32> to vector<16xf32>
    %113 = vector.shape_cast %112 : vector<16xf32> to vector<16x1xf32>
    %cst_42 = arith.constant 3.200000e+01 : f32
    %114 = vector.broadcast %cst_42 : f32 to vector<16x1xf32>
    %115 = arith.divf %113, %114 : vector<16x1xf32>
    %116 = vector.broadcast %115 : vector<16x1xf32> to vector<16x32xf32>
    %117 = arith.subf %111, %116 : vector<16x32xf32>
    %118 = arith.mulf %117, %117 : vector<16x32xf32>
    %cst_43 = arith.constant dense<0.000000e+00> : vector<16xf32>
    %119 = vector.multi_reduction <add>, %118, %cst_43 [1] : vector<16x32xf32> to vector<16xf32>
    %120 = vector.shape_cast %119 : vector<16xf32> to vector<16x1xf32>
    %cst_44 = arith.constant 3.200000e+01 : f32
    %121 = vector.broadcast %cst_44 : f32 to vector<16x1xf32>
    %122 = arith.divf %120, %121 : vector<16x1xf32>
    %123 = vector.broadcast %115 : vector<16x1xf32> to vector<16x32xf32>
    %124 = arith.subf %111, %123 : vector<16x32xf32>
    %cst_45 = arith.constant 9.99999974E-6 : f32
    %125 = vector.broadcast %cst_45 : f32 to vector<16x1xf32>
    %126 = arith.addf %122, %125 : vector<16x1xf32>
    %127 = math.rsqrt %126 : vector<16x1xf32>
    %128 = vector.broadcast %127 : vector<16x1xf32> to vector<16x32xf32>
    %129 = arith.mulf %124, %128 : vector<16x32xf32>
    %c0_46 = arith.constant 0 : index
    %c0_47 = arith.constant 0 : index
    %c0_48 = arith.constant 0 : index
    %130 = vector.load %arg8[%c0_46, %c0_47, %c0_48] : memref<1x1x32xf32, #tpu.memory_space<vmem>>, vector<1x1x32xf32>
    %131 = vector.shape_cast %130 : vector<1x1x32xf32> to vector<1x32xf32>
    %132 = vector.broadcast %131 : vector<1x32xf32> to vector<16x32xf32>
    %133 = arith.mulf %129, %132 : vector<16x32xf32>
    %c0_49 = arith.constant 0 : index
    %c0_50 = arith.constant 0 : index
    %c0_51 = arith.constant 0 : index
    %134 = vector.load %arg9[%c0_49, %c0_50, %c0_51] : memref<1x1x32xf32, #tpu.memory_space<vmem>>, vector<1x1x32xf32>
    %135 = vector.shape_cast %134 : vector<1x1x32xf32> to vector<1x32xf32>
    %136 = vector.broadcast %135 : vector<1x32xf32> to vector<16x32xf32>
    %137 = arith.addf %133, %136 : vector<16x32xf32>
    %138 = arith.truncf %137 : vector<16x32xf32> to vector<16x32xbf16>
    %c0_52 = arith.constant 0 : index
    %c0_53 = arith.constant 0 : index
    %c0_54 = arith.constant 0 : index
    %139 = vector.load %arg12[%c0_52, %c0_53, %c0_54] : memref<1x32x2048xbf16, #tpu.memory_space<vmem>>, vector<1x32x2048xbf16>
    %140 = vector.shape_cast %139 : vector<1x32x2048xbf16> to vector<32x2048xbf16>
    %cst_55 = arith.constant dense<0.000000e+00> : vector<16x2048xf32>
    %141 = tpu.matmul %138, %140, %cst_55 {dimension_numbers = #tpu.dot_dimension_numbers<[1], [0], [0], [1], [0, 0, 1, 1], [], []>} : vector<16x32xbf16>, vector<32x2048xbf16>, vector<16x2048xf32> -> vector<16x2048xf32>
    %c0_56 = arith.constant 0 : index
    %c0_57 = arith.constant 0 : index
    %c0_58 = arith.constant 0 : index
    %142 = vector.load %arg13[%c0_56, %c0_57, %c0_58] : memref<1x1x2048xf32, #tpu.memory_space<vmem>>, vector<1x1x2048xf32>
    %143 = vector.shape_cast %142 : vector<1x1x2048xf32> to vector<1x2048xf32>
    %144 = vector.broadcast %143 : vector<1x2048xf32> to vector<16x2048xf32>
    %145 = arith.addf %141, %144 : vector<16x2048xf32>
    %cst_59 = arith.constant 0.000000e+00 : f32
    %146 = vector.broadcast %cst_59 : f32 to vector<16x2048xf32>
    %147 = arith.maximumf %145, %146 : vector<16x2048xf32>
    %148 = arith.truncf %147 : vector<16x2048xf32> to vector<16x2048xbf16>
    %c0_60 = arith.constant 0 : index
    %c0_61 = arith.constant 0 : index
    %c0_62 = arith.constant 0 : index
    %149 = vector.load %arg14[%c0_60, %c0_61, %c0_62] : memref<1x2048x32xbf16, #tpu.memory_space<vmem>>, vector<1x2048x32xbf16>
    %150 = vector.shape_cast %149 : vector<1x2048x32xbf16> to vector<2048x32xbf16>
    %cst_63 = arith.constant dense<0.000000e+00> : vector<16x32xf32>
    %151 = tpu.matmul %148, %150, %cst_63 {dimension_numbers = #tpu.dot_dimension_numbers<[1], [0], [0], [1], [0, 0, 1, 1], [], []>} : vector<16x2048xbf16>, vector<2048x32xbf16>, vector<16x32xf32> -> vector<16x32xf32>
    %c0_64 = arith.constant 0 : index
    %c0_65 = arith.constant 0 : index
    %c0_66 = arith.constant 0 : index
    %152 = vector.load %arg15[%c0_64, %c0_65, %c0_66] : memref<1x1x32xf32, #tpu.memory_space<vmem>>, vector<1x1x32xf32>
    %153 = vector.shape_cast %152 : vector<1x1x32xf32> to vector<1x32xf32>
    %154 = vector.broadcast %153 : vector<1x32xf32> to vector<16x32xf32>
    %155 = arith.addf %151, %154 : vector<16x32xf32>
    %156 = arith.addf %137, %155 : vector<16x32xf32>
    %cst_67 = arith.constant dense<0.000000e+00> : vector<16xf32>
    %157 = vector.multi_reduction <add>, %156, %cst_67 [1] : vector<16x32xf32> to vector<16xf32>
    %158 = vector.shape_cast %157 : vector<16xf32> to vector<16x1xf32>
    %cst_68 = arith.constant 3.200000e+01 : f32
    %159 = vector.broadcast %cst_68 : f32 to vector<16x1xf32>
    %160 = arith.divf %158, %159 : vector<16x1xf32>
    %161 = vector.broadcast %160 : vector<16x1xf32> to vector<16x32xf32>
    %162 = arith.subf %156, %161 : vector<16x32xf32>
    %163 = arith.mulf %162, %162 : vector<16x32xf32>
    %cst_69 = arith.constant dense<0.000000e+00> : vector<16xf32>
    %164 = vector.multi_reduction <add>, %163, %cst_69 [1] : vector<16x32xf32> to vector<16xf32>
    %165 = vector.shape_cast %164 : vector<16xf32> to vector<16x1xf32>
    %cst_70 = arith.constant 3.200000e+01 : f32
    %166 = vector.broadcast %cst_70 : f32 to vector<16x1xf32>
    %167 = arith.divf %165, %166 : vector<16x1xf32>
    %168 = vector.broadcast %160 : vector<16x1xf32> to vector<16x32xf32>
    %169 = arith.subf %156, %168 : vector<16x32xf32>
    %cst_71 = arith.constant 9.99999974E-6 : f32
    %170 = vector.broadcast %cst_71 : f32 to vector<16x1xf32>
    %171 = arith.addf %167, %170 : vector<16x1xf32>
    %172 = math.rsqrt %171 : vector<16x1xf32>
    %173 = vector.broadcast %172 : vector<16x1xf32> to vector<16x32xf32>
    %174 = arith.mulf %169, %173 : vector<16x32xf32>
    %c0_72 = arith.constant 0 : index
    %c0_73 = arith.constant 0 : index
    %c0_74 = arith.constant 0 : index
    %175 = vector.load %arg10[%c0_72, %c0_73, %c0_74] : memref<1x1x32xf32, #tpu.memory_space<vmem>>, vector<1x1x32xf32>
    %176 = vector.shape_cast %175 : vector<1x1x32xf32> to vector<1x32xf32>
    %177 = vector.broadcast %176 : vector<1x32xf32> to vector<16x32xf32>
    %178 = arith.mulf %174, %177 : vector<16x32xf32>
    %c0_75 = arith.constant 0 : index
    %c0_76 = arith.constant 0 : index
    %c0_77 = arith.constant 0 : index
    %179 = vector.load %arg11[%c0_75, %c0_76, %c0_77] : memref<1x1x32xf32, #tpu.memory_space<vmem>>, vector<1x1x32xf32>
    %180 = vector.shape_cast %179 : vector<1x1x32xf32> to vector<1x32xf32>
    %181 = vector.broadcast %180 : vector<1x32xf32> to vector<16x32xf32>
    %182 = arith.addf %178, %181 : vector<16x32xf32>
    %c0_78 = arith.constant 0 : index
    %c0_79 = arith.constant 0 : index
    %183 = vector.load %arg17[%c0_78, %c0_79] : memref<16x32xf32, #tpu.memory_space<vmem>>, vector<16x32xf32>
    tpu.vector_store %arg17[%c0_78, %c0_79], %182 {strides = array<i32>} : memref<16x32xf32, #tpu.memory_space<vmem>>, vector<16x32xf32>,
    %c1_i32 = arith.constant 1 : i32
    %184 = arith.cmpi eq, %arg1, %c1_i32 : i32
    %185 = arith.extui %184 : i1 to i32
    %c0_i32_80 = arith.constant 0 : i32
    %186 = arith.cmpi ne, %185, %c0_i32_80 : i32
    scf.if %186 {
      %c0_81 = arith.constant 0 : index
      %c0_82 = arith.constant 0 : index
      %c0_83 = arith.constant 0 : index
      %187 = vector.load %arg16[%c0_81, %c0_82, %c0_83] : memref<1x16x32xf32, #tpu.memory_space<vmem>>, vector<1x16x32xf32>
      %188 = vector.shape_cast %187 : vector<1x16x32xf32> to vector<16x32xf32>
      %189 = vector.shape_cast %182 : vector<16x32xf32> to vector<1x16x32xf32>
      tpu.vector_store %arg16[%c0_81, %c0_82, %c0_83], %189 {strides = array<i32>} : memref<1x16x32xf32, #tpu.memory_space<vmem>>, vector<1x16x32xf32>,
    } else {
    }
    return
  }
  func.func @transform_0(%arg0: i32, %arg1: i32) -> (i32, i32, i32) {
    %c0_i32 = arith.constant 0 : i32
    %c0_i32_0 = arith.constant 0 : i32
    %c0_i32_1 = arith.constant 0 : i32
    return %arg0, %c0_i32, %c0_i32_0 : i32, i32, i32
  }
  func.func @transform_1(%arg0: i32, %arg1: i32) -> (i32, i32) {
    %c0_i32 = arith.constant 0 : i32
    %c0_i32_0 = arith.constant 0 : i32
    %c0_i32_1 = arith.constant 0 : i32
    return %c0_i32, %c0_i32_0 : i32, i32
  }
  func.func @transform_2(%arg0: i32, %arg1: i32) -> (i32, i32, i32) {
    %c0_i32 = arith.constant 0 : i32
    %c0_i32_0 = arith.constant 0 : i32
    %c0_i32_1 = arith.constant 0 : i32
    return %arg1, %c0_i32, %c0_i32_0 : i32, i32, i32
  }
  func.func @transform_3(%arg0: i32, %arg1: i32) -> (i32, i32, i32) {
    %c0_i32 = arith.constant 0 : i32
    %c0_i32_0 = arith.constant 0 : i32
    %c0_i32_1 = arith.constant 0 : i32
    return %arg1, %c0_i32, %c0_i32_0 : i32, i32, i32
  }
  func.func @transform_4(%arg0: i32, %arg1: i32) -> (i32, i32, i32) {
    %c0_i32 = arith.constant 0 : i32
    %c0_i32_0 = arith.constant 0 : i32
    %c0_i32_1 = arith.constant 0 : i32
    return %arg1, %c0_i32, %c0_i32_0 : i32, i32, i32
  }
  func.func @transform_5(%arg0: i32, %arg1: i32) -> (i32, i32, i32) {
    %c0_i32 = arith.constant 0 : i32
    %c0_i32_0 = arith.constant 0 : i32
    %c0_i32_1 = arith.constant 0 : i32
    return %arg1, %c0_i32, %c0_i32_0 : i32, i32, i32
  }
  func.func @transform_6(%arg0: i32, %arg1: i32) -> (i32, i32, i32) {
    %c0_i32 = arith.constant 0 : i32
    %c0_i32_0 = arith.constant 0 : i32
    %c0_i32_1 = arith.constant 0 : i32
    return %arg1, %c0_i32, %c0_i32_0 : i32, i32, i32
  }
  func.func @transform_7(%arg0: i32, %arg1: i32) -> (i32, i32, i32) {
    %c0_i32 = arith.constant 0 : i32
    %c0_i32_0 = arith.constant 0 : i32
    %c0_i32_1 = arith.constant 0 : i32
    return %arg1, %c0_i32, %c0_i32_0 : i32, i32, i32
  }
  func.func @transform_8(%arg0: i32, %arg1: i32) -> (i32, i32, i32) {
    %c0_i32 = arith.constant 0 : i32
    %c0_i32_0 = arith.constant 0 : i32
    %c0_i32_1 = arith.constant 0 : i32
    return %arg1, %c0_i32, %c0_i32_0 : i32, i32, i32
  }
  func.func @transform_9(%arg0: i32, %arg1: i32) -> (i32, i32, i32) {
    %c0_i32 = arith.constant 0 : i32
    %c0_i32_0 = arith.constant 0 : i32
    %c0_i32_1 = arith.constant 0 : i32
    return %arg1, %c0_i32, %c0_i32_0 : i32, i32, i32
  }
  func.func @transform_10(%arg0: i32, %arg1: i32) -> (i32, i32, i32) {
    %c0_i32 = arith.constant 0 : i32
    %c0_i32_0 = arith.constant 0 : i32
    %c0_i32_1 = arith.constant 0 : i32
    return %arg1, %c0_i32, %c0_i32_0 : i32, i32, i32
  }
  func.func @transform_11(%arg0: i32, %arg1: i32) -> (i32, i32, i32) {
    %c0_i32 = arith.constant 0 : i32
    %c0_i32_0 = arith.constant 0 : i32
    %c0_i32_1 = arith.constant 0 : i32
    return %arg1, %c0_i32, %c0_i32_0 : i32, i32, i32
  }
  func.func @transform_12(%arg0: i32, %arg1: i32) -> (i32, i32, i32) {
    %c0_i32 = arith.constant 0 : i32
    %c0_i32_0 = arith.constant 0 : i32
    %c0_i32_1 = arith.constant 0 : i32
    return %arg1, %c0_i32, %c0_i32_0 : i32, i32, i32
  }
  func.func @transform_13(%arg0: i32, %arg1: i32) -> (i32, i32, i32) {
    %c0_i32 = arith.constant 0 : i32
    %c0_i32_0 = arith.constant 0 : i32
    %c0_i32_1 = arith.constant 0 : i32
    return %arg1, %c0_i32, %c0_i32_0 : i32, i32, i32
  }
  func.func @transform_14(%arg0: i32, %arg1: i32) -> (i32, i32, i32) {
    %c0_i32 = arith.constant 0 : i32
    %c0_i32_0 = arith.constant 0 : i32
    %c0_i32_1 = arith.constant 0 : i32
    return %arg0, %c0_i32, %c0_i32_0 : i32, i32, i32
  }
}

module attributes {stable_mosaic.version = 11 : i64} {
  func.func @classifier_kernel(%arg0: i32, %arg1: memref<1x8x32xf32, #tpu.memory_space<vmem>>, %arg2: memref<32x1024xbf16, #tpu.memory_space<vmem>>, %arg3: memref<1x1024xf32, #tpu.memory_space<vmem>>, %arg4: memref<1024x128xbf16, #tpu.memory_space<vmem>>, %arg5: memref<1x128xf32, #tpu.memory_space<vmem>>, %arg6: memref<1x8x128xf32, #tpu.memory_space<vmem>>) attributes {dimension_semantics = [#tpu.dimension_semantics<parallel>], iteration_bounds = array<i64: 2>, scalar_prefetch = 0 : i64, scratch_operands = 0 : i64, tpu.core_type = #tpu.core_type<tc>, window_params = [{transform_indices = @transform_0, window_bounds = array<i64: 1, 8, 32>}, {pipeline_mode = #tpu.pipeline_mode<synchronous>, transform_indices = @transform_1, window_bounds = array<i64: 32, 1024>}, {pipeline_mode = #tpu.pipeline_mode<synchronous>, transform_indices = @transform_2, window_bounds = array<i64: 1, 1024>}, {pipeline_mode = #tpu.pipeline_mode<synchronous>, transform_indices = @transform_3, window_bounds = array<i64: 1024, 128>}, {pipeline_mode = #tpu.pipeline_mode<synchronous>, transform_indices = @transform_4, window_bounds = array<i64: 1, 128>}, {transform_indices = @transform_5, window_bounds = array<i64: 1, 8, 128>}]} {
    %c0 = arith.constant 0 : index
    %c0_0 = arith.constant 0 : index
    %c0_1 = arith.constant 0 : index
    %0 = vector.load %arg1[%c0, %c0_0, %c0_1] : memref<1x8x32xf32, #tpu.memory_space<vmem>>, vector<1x8x32xf32>
    %1 = vector.shape_cast %0 : vector<1x8x32xf32> to vector<8x32xf32>
    %2 = arith.truncf %1 : vector<8x32xf32> to vector<8x32xbf16>
    %c0_2 = arith.constant 0 : index
    %c0_3 = arith.constant 0 : index
    %3 = vector.load %arg2[%c0_2, %c0_3] : memref<32x1024xbf16, #tpu.memory_space<vmem>>, vector<32x1024xbf16>
    %cst = arith.constant dense<0.000000e+00> : vector<8x1024xf32>
    %4 = tpu.matmul %2, %3, %cst {dimension_numbers = #tpu.dot_dimension_numbers<[1], [0], [0], [1], [0, 0, 1, 1], [], []>} : vector<8x32xbf16>, vector<32x1024xbf16>, vector<8x1024xf32> -> vector<8x1024xf32>
    %c0_4 = arith.constant 0 : index
    %c0_5 = arith.constant 0 : index
    %5 = vector.load %arg3[%c0_4, %c0_5] : memref<1x1024xf32, #tpu.memory_space<vmem>>, vector<1x1024xf32>
    %6 = vector.broadcast %5 : vector<1x1024xf32> to vector<8x1024xf32>
    %7 = arith.addf %4, %6 : vector<8x1024xf32>
    %cst_6 = arith.constant 0.000000e+00 : f32
    %8 = vector.broadcast %cst_6 : f32 to vector<8x1024xf32>
    %9 = arith.maximumf %7, %8 : vector<8x1024xf32>
    %10 = arith.truncf %9 : vector<8x1024xf32> to vector<8x1024xbf16>
    %c0_7 = arith.constant 0 : index
    %c0_8 = arith.constant 0 : index
    %11 = vector.load %arg4[%c0_7, %c0_8] : memref<1024x128xbf16, #tpu.memory_space<vmem>>, vector<1024x128xbf16>
    %cst_9 = arith.constant dense<0.000000e+00> : vector<8x128xf32>
    %12 = tpu.matmul %10, %11, %cst_9 {dimension_numbers = #tpu.dot_dimension_numbers<[1], [0], [0], [1], [0, 0, 1, 1], [], []>} : vector<8x1024xbf16>, vector<1024x128xbf16>, vector<8x128xf32> -> vector<8x128xf32>
    %c0_10 = arith.constant 0 : index
    %c0_11 = arith.constant 0 : index
    %13 = vector.load %arg5[%c0_10, %c0_11] : memref<1x128xf32, #tpu.memory_space<vmem>>, vector<1x128xf32>
    %14 = vector.broadcast %13 : vector<1x128xf32> to vector<8x128xf32>
    %15 = arith.addf %12, %14 : vector<8x128xf32>
    %c0_12 = arith.constant 0 : index
    %c0_13 = arith.constant 0 : index
    %c0_14 = arith.constant 0 : index
    %16 = vector.load %arg6[%c0_12, %c0_13, %c0_14] : memref<1x8x128xf32, #tpu.memory_space<vmem>>, vector<1x8x128xf32>
    %17 = vector.shape_cast %16 : vector<1x8x128xf32> to vector<8x128xf32>
    %18 = vector.shape_cast %15 : vector<8x128xf32> to vector<1x8x128xf32>
    tpu.vector_store %arg6[%c0_12, %c0_13, %c0_14], %18 {strides = array<i32>} : memref<1x8x128xf32, #tpu.memory_space<vmem>>, vector<1x8x128xf32>,
    return
  }
  func.func @transform_0(%arg0: i32) -> (i32, i32, i32) {
    %c0_i32 = arith.constant 0 : i32
    %c0_i32_0 = arith.constant 0 : i32
    %c0_i32_1 = arith.constant 0 : i32
    return %arg0, %c0_i32, %c0_i32_0 : i32, i32, i32
  }
  func.func @transform_1(%arg0: i32) -> (i32, i32) {
    %c0_i32 = arith.constant 0 : i32
    %c0_i32_0 = arith.constant 0 : i32
    %c0_i32_1 = arith.constant 0 : i32
    return %c0_i32, %c0_i32_0 : i32, i32
  }
  func.func @transform_2(%arg0: i32) -> (i32, i32) {
    %c0_i32 = arith.constant 0 : i32
    %c0_i32_0 = arith.constant 0 : i32
    %c0_i32_1 = arith.constant 0 : i32
    return %c0_i32, %c0_i32_0 : i32, i32
  }
  func.func @transform_3(%arg0: i32) -> (i32, i32) {
    %c0_i32 = arith.constant 0 : i32
    %c0_i32_0 = arith.constant 0 : i32
    %c0_i32_1 = arith.constant 0 : i32
    return %c0_i32, %c0_i32_0 : i32, i32
  }
  func.func @transform_4(%arg0: i32) -> (i32, i32) {
    %c0_i32 = arith.constant 0 : i32
    %c0_i32_0 = arith.constant 0 : i32
    %c0_i32_1 = arith.constant 0 : i32
    return %c0_i32, %c0_i32_0 : i32, i32
  }
  func.func @transform_5(%arg0: i32) -> (i32, i32, i32) {
    %c0_i32 = arith.constant 0 : i32
    %c0_i32_0 = arith.constant 0 : i32
    %c0_i32_1 = arith.constant 0 : i32
    return %arg0, %c0_i32, %c0_i32_0 : i32, i32, i32
  }
}

</mosaic_0001>

<bundles_post_ra>
// kernel: decoder_transformer_forward.3
= control target key start
LH: loop header
LB: loop body
LE: loop exit
PB: predicated region body
PF: predicated region fallthrough
CT: control target
= control target key end

     0   :  { %10 = vsyncpa [#allocation3], 0  ;;  %s2041_s0 = inlined_call_operand.vmem [shape: f32[2,8,32], index: 0, kind: input, shape index: {}]   ;;  %s2042_s1 = inlined_call_operand.vmem [shape: bf16[32,1024], index: 1, kind: input, shape index: {}]   ;;  %s2043_s2 = inlined_call_operand.vmem [shape: f32[1,1024], index: 2, kind: input, shape index: {}]   ;;  %s2044_s3 = inlined_call_operand.vmem [shape: bf16[1024,128], index: 3, kind: input, shape index: {}]   ;;  %s2045_s4 = inlined_call_operand.vmem [shape: f32[1,128], index: 4, kind: input, shape index: {}]   ;;  %s2046_s5 = inlined_call_operand.hbm [shape: f32[2,8,128], index: 5, kind: output, shape index: {}]  }
   0x1   :  { %12 = vsyncpa [#allocation3 + $0x1], 0  ;;  %s1679_s18 = smov 0   ;;  %s1681_s19 = smov 0  }
   0x2   :  { %s1683_s20 = smov 0   ;;  %s1685_s21 = smov 0  }
   0x3 LB: > { %s1700_s22 = sadd.s32 4294967295, %s1645_s21   ;;  %s1298_s23 = sadd.s32 4294967294, %s1645_s21   ;;  %s1645_s21 = sphi %s1685_s21, %s2052_s21   ;;  %s1641_s20 = sphi %s1683_s20, %s2051_s20   ;;  %s1637_s19 = sphi %s1681_s19, %s2050_s19   ;;  %s1633_s18 = sphi %s1679_s18, %s2049_s18  }
   0x4   : > { %s1704_s24 = sadd.s32 1, %s1645_s21   ;;  %s135_s25 = sadd.s32 1, %s1641_s20 }
   0x5   : > { %s132_s26 = ssub.s32 %s1645_s21, %s1704_s24  ;;  %p145_p0 = scmp.ne.s32.totalorder %s1641_s20, %s1637_s19 }
   0x6   : > { %p133_p1 = scmp.eq.s32.totalorder %s132_s26, 0  ;;  %p146_p2 = scmp.eq.s32.totalorder %s1700_s22, 1 }
   0x7   : > { %p151_p3 = scmp.ne.s32.totalorder %s1637_s19, %s1633_s18  ;;  %p152_p4 = scmp.eq.s32.totalorder %s1298_s23, 1 }
   0x8   : > { %s1715_s27 = scalar_select %p133_p1, %s1641_s20, %s135_s25  }
   0x9   : > { %p1717_p5 = por %p146_p2, %p145_p0  ;;  %p1721_p6 = por %p152_p4, %p151_p3 }
   0xa   : > { %p1301_p7 = scmp.ge.s32.totalorder %s1645_s21, 1  ;;  %p189_p8 = scmp.lt.s32.totalorder %s1645_s21, 3 }
   0xc   : > { %p190_p9 = pnand %p1301_p7, %p189_p8 }
   0xd   : > { %p216_p10 = scmp.lt.s32.totalorder (!%p190_p9), %s1700_s22, 1  ;;  %s213_s12 = sand.u32 (!%p190_p9), 1, %s1637_s19  }
   0xe   : > { %193 = sbr.rel (%p190_p9) target bundleno = 479 (0x1df), region = 40  ;;  %s1302_s15 = sshll.u32 (!%p190_p9), %s213_s12, 3 }
   0xf   : > { %s1390_s16 = sshll.u32 (!%p190_p9), %s1700_s22, 7  ;;  %s215_s17 = scalar_lea.vmem (!%p190_p9), [#allocation2], %s1302_s15 }
  0x10   : > { %s1239_s23 = sshll.u32 (!%p190_p9), %s215_s17, 4  ;;  %s1237_s6 = scalar_lea.hbm (!%p190_p9), %s2046_s5, %s1390_s16  ;;  %s1240_s23 = int_to_ptr.vmem [resolvable:$true] %s1239_s23 }
  0x11   : > { %s1585_s7 = scalar_lea.vmem (!%p190_p9), %s1240_s23, 128 }
  0x12   : > { %p1586_p11 = scmp.ne.s32.totalorder (!%p190_p9), %s1240_s23, %s1585_s7 }
  0x13   : > { %v231_v0 = vld [vmem:[%s2042_s1 + $0x40] sm:$0xff]  ;;  %v232_v2 = vld [vmem:[%s2042_s1 + $0x48] sm:$0xff]  ;;  %v1647_v8 = vmov 0   ;;  %s217_s30 = scalar_select %p216_p10, %s1700_s22, 1  ;;  %v233_v14 = vld [vmem:[%s2042_s1 + $0x50] sm:$0xff]  ;;  %vm361_vm0 = vcmask 261120  }
  0x14   : > { %v235_v1 = vld [vmem:[%s2042_s1 + $0x60] sm:$0xff]  ;;  %v236_v4 = vld [vmem:[%s2042_s1 + $0x68] sm:$0xff]  ;;  %397 = vmatprep.mubr.bf16.mxu0 %v1647_v8  ;;  %438 = vmatprep.mubr.bf16.mxu1 %v1647_v8  ;;  %v237_v16 = vld [vmem:[%s2042_s1 + $0x70] sm:$0xff]  ;;  %p1587_p12 = pnand %p1586_p11, %p1717_p5  ;;  %s1648_s22 = smov [#allocation2]  }
  0x15   : > { %v1313_v3 = vcombine.high %v231_v0, %v235_v1  ;;  %v1312_v5 = vcombine.low %v231_v0, %v235_v1  ;;  %v223_v6 = vld [vmem:[%s2042_s1] sm:$0xff]  ;;  %v1315_v9 = vcombine.high %v232_v2, %v236_v4  ;;  %v1314_v10 = vcombine.low %v232_v2, %v236_v4  ;;  %v224_v12 = vld [vmem:[%s2042_s1 + $0x8] sm:$0xff]  ;;  %v234_v17 = vld [vmem:[%s2042_s1 + $0x58] sm:$0xff]  ;;  %s1303_s14 = sshll.u32 %s217_s30, 3  ;;  %s1226_s30 = scalar_lea.sflag [#allocation3], %s213_s12 }
  0x16   : > { %v227_v7 = vld [vmem:[%s2042_s1 + $0x20] sm:$0xff]  ;;  %v228_v13 = vld [vmem:[%s2042_s1 + $0x28] sm:$0xff]  ;;  %v238_v18 = vld [vmem:[%s2042_s1 + $0x78] sm:$0xff]  ;;  %s219_s25 = scalar_lea.vmem %s2041_s0, %s1303_s14  ;;  %v1317_v22 = vcombine.high %v233_v14, %v237_v16  ;;  %v1316_v29 = vcombine.low %v233_v14, %v237_v16  ;;  %p1588_p13 = pneg %p1587_p12 }
  0x17   : > { %v1305_v11 = vcombine.high %v223_v6, %v227_v7  ;;  %377 = vmatprep.subr.bf16.mxu0 %v1313_v3  ;;  %v1307_v15 = vcombine.high %v224_v12, %v228_v13  ;;  %418 = vmatprep.subr.bf16.mxu1 %v1315_v9  ;;  %v1304_v19 = vcombine.low %v223_v6, %v227_v7  ;;  %v225_v20 = vld [vmem:[%s2042_s1 + $0x10] sm:$0xff]  ;;  %v221_v24 = vld [vmem:[%s219_s25] sm:$0xff]  ;;  %v226_v26 = vld [vmem:[%s2042_s1 + $0x18] sm:$0xff]  ;;  %s1589_s8 = sshll.u32 %s1648_s22, 4  ;;  %s1590_s8 = int_to_ptr.vmem [resolvable:$false] %s1589_s8 }
  0x18   : > { %378 = vmatpush1.bf16.msra.mxu0 %v1312_v5  ;;  %419 = vmatpush1.bf16.msra.mxu1 %v1314_v10  ;;  %v1306_v21 = vcombine.low %v224_v12, %v228_v13  ;;  %v229_v23 = vld [vmem:[%s2042_s1 + $0x30] sm:$0xff]  ;;  %v1319_v25 = vcombine.high %v234_v17, %v238_v18  ;;  %v222_v27 = vpack.c.bf16 %v221_v24, %v221_v24  ;;  %v230_v28 = vld [vmem:[%s2042_s1 + $0x38] sm:$0xff]  ;;  %v1529_v43 = vld [vmem:[%s2044_s3 + $0x68] sm:$0xff]   ;;  %v241_v5 = vlaneseq  ;;  %s1591_s9 = scalar_lea.vmem %s1590_s8, 256  ;;  %p1592_p0 = scmp.lt.s32.totalorder %s1240_s23, %s1590_s8 }
  0x19   : > { %379 = vmatprep.subr.bf16.mxu0 %v1305_v11  ;;  %420 = vmatprep.subr.bf16.mxu1 %v1307_v15  ;;  %v1318_v30 = vcombine.low %v234_v17, %v238_v18  ;;  %v1309_v31 = vcombine.high %v225_v20, %v229_v23  ;;  %v1311_v32 = vcombine.high %v226_v26, %v230_v28  ;;  %v1521_v35 = vld [vmem:[%s2044_s3 + $0x78] sm:$0xff]   ;;  %v1525_v39 = vld [vmem:[%s2044_s3 + $0x70] sm:$0xff]   ;;  %v1530_v44 = vld [vmem:[%s2044_s3 + $0xe8] sm:$0xff]   ;;  %p1593_p1 = scmp.lt.s32.totalorder %s1591_s9, %s1585_s7 }
  0x1a   : > { %v1308_v33 = vcombine.low %v225_v20, %v229_v23  ;;  %v1310_v34 = vcombine.low %v226_v26, %v230_v28  ;;  %v1522_v36 = vld [vmem:[%s2044_s3 + $0xf8] sm:$0xff]   ;;  %v1526_v40 = vld [vmem:[%s2044_s3 + $0xf0] sm:$0xff]   ;;  %v1531_v45 = vld [vmem:[%s2044_s3 + $0x28] sm:$0xff]   ;;  %v1888_v6 = vshrl.u32 %v241_v5, 7 }
  0x1b   : > { %v1523_v37 = vld [vmem:[%s2044_s3 + $0x38] sm:$0xff]   ;;  %v1527_v41 = vld [vmem:[%s2044_s3 + $0x30] sm:$0xff]   ;;  %v1532_v46 = vld [vmem:[%s2044_s3 + $0xa8] sm:$0xff]   ;;  %p1594_p2 = por %p1593_p1, %p1592_p0 }
  0x1c   : > { %380 = vmatpush1.bf16.msra.mxu0 %v1304_v19  ;;  %421 = vmatpush1.bf16.msra.mxu1 %v1306_v21  ;;  %v1524_v38 = vld [vmem:[%s2044_s3 + $0xb8] sm:$0xff]   ;;  %v1528_v42 = vld [vmem:[%s2044_s3 + $0xb0] sm:$0xff]   ;;  %v1533_v47 = vld [vmem:[%s2044_s3 + $0x60] sm:$0xff]   ;;  %v243_v7 = vsub.s32 0, %v1888_v6  ;;  %v251_v9 = vsub.s32 2, %v1888_v6  ;;  %v247_v10 = vsub.s32 1, %v1888_v6 }
  0x1d   : > { %459 = vmatprep.subr.bf16.mxu0 %v1317_v22  ;;  %500 = vmatprep.subr.bf16.mxu1 %v1319_v25  ;;  %v1534_v48 = vld [vmem:[%s2044_s3 + $0xe0] sm:$0xff]   ;;  %v1537_v51 = vld [vmem:[%s2044_s3 + $0x58] sm:$0xff]   ;;  %v1541_v55 = vld [vmem:[%s2044_s3 + $0x50] sm:$0xff]   ;;  %v255_v11 = vsub.s32 3, %v1888_v6  ;;  %v263_v23 = vsub.s32 5, %v1888_v6  ;;  %v271_v28 = vsub.s32 7, %v1888_v6  ;;  %p1595_p3 = pnand %p1594_p2, %p1588_p13 }
  0x1e   : > { %v1535_v49 = vld [vmem:[%s2044_s3 + $0x20] sm:$0xff]   ;;  %v1538_v52 = vld [vmem:[%s2044_s3 + $0xd8] sm:$0xff]   ;;  %v1542_v56 = vld [vmem:[%s2044_s3 + $0xd0] sm:$0xff]  }
  0x1f   : > { %1320 = vmatmul.mubr.msk.bf16.vlgmr.msra.gmra.mxu0 %vm361_vm0, %v222_v27  ;;  %1321 = vmatmul.mubr.msk.bf16.vlgmr.msra.gmra.mxu1 %vm361_vm0, %v222_v27  ;;  %v1536_v50 = vld [vmem:[%s2044_s3 + $0xa0] sm:$0xff]   ;;  %v1539_v53 = vld [vmem:[%s2044_s3 + $0x18] sm:$0xff]   ;;  %v1543_v57 = vld [vmem:[%s2044_s3 + $0x10] sm:$0xff]  }
  0x20   : > { %460 = vmatpush1.bf16.msra.mxu0 %v1316_v29  ;;  %501 = vmatpush1.bf16.msra.mxu1 %v1318_v30  ;;  %v1540_v54 = vld [vmem:[%s2044_s3 + $0x98] sm:$0xff]   ;;  %v1544_v58 = vld [vmem:[%s2044_s3 + $0x90] sm:$0xff]   ;;  %v1545_v59 = vld [vmem:[%s2044_s3 + $0x48] sm:$0xff]  }
  0x21   : > { %461 = vmatprep.subr.bf16.mxu0 %v1309_v31  ;;  %502 = vmatprep.subr.bf16.mxu1 %v1311_v32  ;;  %v1546_v60 = vld [vmem:[%s2044_s3 + $0xc8] sm:$0xff]   ;;  %v1549_v63 = vld [vmem:[%s2044_s3 + $0x40] sm:$0xff]   ;;  %v1553_v3 = vld [vmem:[%s2044_s3 + $0x178] sm:$0xff]  }
  0x22   : > { %479 = vmatprep.mubr.bf16.mxu0 %v1647_v8  ;;  %520 = vmatprep.mubr.bf16.mxu1 %v1647_v8  ;;  %v1547_v61 = vld [vmem:[%s2044_s3 + $0x8] sm:$0xff]   ;;  %v1550_v0 = vld [vmem:[%s2044_s3 + $0xc0] sm:$0xff]   ;;  %v1554_v4 = vld [vmem:[%s2044_s3 + $0x1f8] sm:$0xff]  }
  0x23   : > { %v1548_v62 = vld [vmem:[%s2044_s3 + $0x88] sm:$0xff]   ;;  %v1551_v1 = vld [vmem:[%s2044_s3] sm:$0xff]   ;;  %v1570_v5 = vld [vmem:[%s2044_s3 + $0x1d8] sm:$0xff]  }
  0x24   : > { %462 = vmatpush1.bf16.msra.mxu0 %v1308_v33  ;;  %503 = vmatpush1.bf16.msra.mxu1 %v1310_v34  ;;  %v1552_v2 = vld [vmem:[%s2044_s3 + $0x80] sm:$0xff]  }
  0x25   : > { %1393 = vmatprep.subr.bf16.mxu0 %v1521_v35  ;;  %1415 = vmatprep.subr.bf16.mxu1 %v1522_v36  ;;  %v1894_v8 = vld [vmem:[%s2043_s2] sm:$0xff]  ;;  %v1555_v36 = vld [vmem:[%s2044_s3 + $0x138] sm:$0xff]  }
  0x26   : > { %v244_v12 = vrot.slane %v1894_v8, %v243_v7  ;;  %v252_v13 = vrot.slane %v1894_v8, %v251_v9  ;;  %v248_v14 = vrot.slane %v1894_v8, %v247_v10  ;;  %v256_v16 = vrot.slane %v1894_v8, %v255_v11  ;;  %v1571_v7 = vld [vmem:[%s2044_s3 + $0x118] sm:$0xff]  }
  0x27   : > { %1322 = vmatmul.mubr.msk.bf16.vlgmr.msra.gmra.mxu0 %vm361_vm0, %v222_v27  ;;  %1323 = vmatmul.mubr.msk.bf16.vlgmr.msra.gmra.mxu1 %vm361_vm0, %v222_v27  ;;  %v267_v9 = vsub.s32 6, %v1888_v6  ;;  %v259_v10 = vsub.s32 4, %v1888_v6  ;;  %v1572_v11 = vld [vmem:[%s2044_s3 + $0x198] sm:$0xff]   ;;  %v1575_v6 = vld [vmem:[%s2044_s3 + $0x110] sm:$0xff]  }
  0x28   : > { %1394 = vmatpush3.bf16.msra.mxu0 %v1523_v37  ;;  %1416 = vmatpush3.bf16.msra.mxu1 %v1524_v38  ;;  %v264_v37 = vrot.slane %v1894_v8, %v263_v23  ;;  %v1582_v23 = vld [vmem:[%s2044_s3 + $0x1c0] sm:$0xff]  }
  0x29   : > { %1395 = vmatprep.subr.bf16.mxu0 %v1525_v39  ;;  %1417 = vmatprep.subr.bf16.mxu1 %v1526_v40  ;;  %v1556_v40 = vld [vmem:[%s2044_s3 + $0x1b8] sm:$0xff]  }
  0x2c   : > { %1396 = vmatpush3.bf16.msra.mxu0 %v1527_v41  ;;  %1418 = vmatpush3.bf16.msra.mxu1 %v1528_v42  ;;  %v1557_v41 = vld [vmem:[%s2044_s3 + $0x170] sm:$0xff]  }
  0x2d   : > { %1397 = vmatprep.subr.bf16.mxu0 %v1529_v43  ;;  %1419 = vmatprep.subr.bf16.mxu1 %v1530_v44  ;;  %v272_v43 = vrot.slane %v1894_v8, %v271_v28  ;;  %v1558_v44 = vld [vmem:[%s2044_s3 + $0x1f0] sm:$0xff]  }
  0x30   : > { %1398 = vmatpush3.bf16.msra.mxu0 %v1531_v45  ;;  %1420 = vmatpush3.bf16.msra.mxu1 %v1532_v46 }
  0x31   : > { %1399 = vmatprep.subr.bf16.mxu0 %v1533_v47  ;;  %1421 = vmatprep.subr.bf16.mxu1 %v1534_v48  ;;  %v1559_v47 = vld [vmem:[%s2044_s3 + $0x130] sm:$0xff]  }
  0x34   : > { %1400 = vmatpush3.bf16.msra.mxu0 %v1535_v49  ;;  %1422 = vmatpush3.bf16.msra.mxu1 %v1536_v50  ;;  %v1560_v50 = vld [vmem:[%s2044_s3 + $0x1b0] sm:$0xff]  }
  0x35   : > { %1401 = vmatprep.subr.bf16.mxu0 %v1537_v51  ;;  %1423 = vmatprep.subr.bf16.mxu1 %v1538_v52  ;;  %v1561_v51 = vld [vmem:[%s2044_s3 + $0x168] sm:$0xff]  }
  0x38   : > { %1402 = vmatpush3.bf16.msra.mxu0 %v1539_v53  ;;  %1424 = vmatpush3.bf16.msra.mxu1 %v1540_v54  ;;  %v1562_v54 = vld [vmem:[%s2044_s3 + $0x1e8] sm:$0xff]  }
  0x39   : > { %1403 = vmatprep.subr.bf16.mxu0 %v1541_v55  ;;  %1425 = vmatprep.subr.bf16.mxu1 %v1542_v56 }
  0x3c   : > { %1404 = vmatpush3.bf16.msra.mxu0 %v1543_v57  ;;  %1426 = vmatpush3.bf16.msra.mxu1 %v1544_v58 }
  0x3d   : > { %1405 = vmatprep.subr.bf16.mxu0 %v1545_v59  ;;  %1427 = vmatprep.subr.bf16.mxu1 %v1546_v60  ;;  %v1563_v59 = vld [vmem:[%s2044_s3 + $0x128] sm:$0xff]  }
  0x40   : > { %1406 = vmatpush3.bf16.msra.mxu0 %v1547_v61  ;;  %1428 = vmatpush3.bf16.msra.mxu1 %v1548_v62  ;;  %v1564_v62 = vld [vmem:[%s2044_s3 + $0x1a8] sm:$0xff]  }
  0x41   : > { %1407 = vmatprep.subr.bf16.mxu0 %v1549_v63  ;;  %1429 = vmatprep.subr.bf16.mxu1 %v1550_v0  ;;  %v1565_v63 = vld [vmem:[%s2044_s3 + $0x160] sm:$0xff]  }
  0x44   : > { %1408 = vmatpush3.bf16.msra.mxu0 %v1551_v1  ;;  %1430 = vmatpush3.bf16.msra.mxu1 %v1552_v2  ;;  %v1566_v1 = vld [vmem:[%s2044_s3 + $0x1e0] sm:$0xff]  }
  0x45   : > { %1437 = vmatprep.subr.bf16.mxu0 %v1553_v3  ;;  %1459 = vmatprep.subr.bf16.mxu1 %v1554_v4  ;;  %v1567_v2 = vld [vmem:[%s2044_s3 + $0x120] sm:$0xff]   ;;  %v1569_v4 = vld [vmem:[%s2044_s3 + $0x158] sm:$0xff]  }
  0x46   : > { %v1568_v3 = vld [vmem:[%s2044_s3 + $0x1a0] sm:$0xff]  }
  0xdf   : > { %v399_v15 = vpop.f32.mrf.mxu0  ;;  %v440_v18 = vpop.f32.mrf.mxu1 }
  0xe0   : > { %v400_v17 = vadd.f32 %v399_v15, %v244_v12  ;;  %v441_v19 = vadd.f32 %v440_v18, %v252_v13  ;;  %v1573_v12 = vld [vmem:[%s2044_s3 + $0x150] sm:$0xff]   ;;  %v260_v15 = vrot.slane %v1894_v8, %v259_v10  ;;  %v1578_v18 = vld [vmem:[%s2044_s3 + $0x1c8] sm:$0xff]  }
  0xe1   : > { %v401_v20 = vpop.f32.mrf.mxu0  ;;  %v442_v22 = vpop.f32.mrf.mxu1  ;;  %v1574_v13 = vld [vmem:[%s2044_s3 + $0x1d0] sm:$0xff]  }
  0xe2   : > { %v402_v21 = vadd.f32 %v401_v20, %v248_v14  ;;  %v529_v24 = vmax.f32 %v400_v17, 0.0  ;;  %v531_v25 = vmax.f32 %v441_v19, 0.0  ;;  %v443_v26 = vadd.f32 %v442_v22, %v256_v16  ;;  %v1576_v16 = vld [vmem:[%s2044_s3 + $0x190] sm:$0xff]   ;;  %v1577_v17 = vld [vmem:[%s2044_s3 + $0x148] sm:$0xff]   ;;  %v1581_v22 = vld [vmem:[%s2044_s3 + $0x140] sm:$0xff]  }
  0xe3   : > { %v403_v27 = vpop.f32.mrf.mxu0  ;;  %v444_v30 = vpop.f32.mrf.mxu1  ;;  %v268_v14 = vrot.slane %v1894_v8, %v267_v9  ;;  %v1579_v8 = vld [vmem:[%s2044_s3 + $0x108] sm:$0xff]  }
  0xe4   : > { %v530_v29 = vmax.f32 %v402_v21, 0.0  ;;  %v532_v31 = vmax.f32 %v443_v26, 0.0  ;;  %v539_v33 = vpack.c.bf16 %v531_v25, %v531_v25  ;;  %v537_v38 = vpack.c.bf16 %v529_v24, %v529_v24  ;;  %v1580_v21 = vld [vmem:[%s2044_s3 + $0x188] sm:$0xff]   ;;  %v1583_v25 = vld [vmem:[%s2044_s3 + $0x100] sm:$0xff]  }
  0xe5   : > { %v404_v32 = vpop.f32.mrf.mxu0  ;;  %v445_v35 = vpop.f32.mrf.mxu1  ;;  %v1584_v27 = vld [vmem:[%s2044_s3 + $0x180] sm:$0xff]  }
  0xe6   : > { %v538_v34 = vpack.c.bf16 %v530_v29, %v530_v29  ;;  %v540_v39 = vpack.c.bf16 %v532_v31, %v532_v31 }
  0xe7   : > { %v1915_v42 = vpop.f32.mrf.mxu0  ;;  %v522_v45 = vpop.f32.mrf.mxu1 }
  0xe8   : > { %1096 = vmatprep.mubr.bf16.mxu0 %v538_v34  ;;  %1136 = vmatprep.mubr.bf16.mxu1 %v540_v39  ;;  %v523_v19 = vadd.f32 %v522_v45, %v268_v14  ;;  %v482_v20 = vadd.f32 %v1915_v42, %v260_v15  ;;  %v1324_v39 = vld [vmem:[%s2045_s4] ss:$0 sm:$0xff] }
  0xe9   : > { %1097 = vmatmul.mubr.bf16.vlgmr.msra.gmra.mxu0 %v537_v38  ;;  %v483_v46 = vpop.f32.mrf.mxu0  ;;  %1137 = vmatmul.mubr.bf16.vlgmr.msra.gmra.mxu1 %v539_v33  ;;  %v524_v49 = vpop.f32.mrf.mxu1 }
  0xea   : > { %1438 = vmatpush3.bf16.msra.mxu0 %v1555_v36  ;;  %v484_v48 = vadd.f32 %v483_v46, %v264_v37  ;;  %1460 = vmatpush3.bf16.msra.mxu1 %v1556_v40  ;;  %v525_v53 = vadd.f32 %v524_v49, %v272_v43  ;;  %v535_v24 = vmax.f32 %v523_v19, 0.0  ;;  %v533_v26 = vmax.f32 %v482_v20, 0.0 }
  0xeb   : > { %1439 = vmatprep.subr.bf16.mxu0 %v1557_v41  ;;  %v485_v52 = vpop.f32.mrf.mxu0  ;;  %1461 = vmatprep.subr.bf16.mxu1 %v1558_v44  ;;  %v526_v56 = vpop.f32.mrf.mxu1 }
  0xec   : > { %v534_v55 = vmax.f32 %v484_v48, 0.0  ;;  %v536_v57 = vmax.f32 %v525_v53, 0.0  ;;  %v543_v28 = vpack.c.bf16 %v535_v24, %v535_v24  ;;  %v541_v29 = vpack.c.bf16 %v533_v26, %v533_v26 }
  0xed   : > { %v486_v58 = vpop.f32.mrf.mxu0  ;;  %v527_v61 = vpop.f32.mrf.mxu1 }
  0xee   : > { %1440 = vmatpush3.bf16.msra.mxu0 %v1559_v47  ;;  %v542_v60 = vpack.c.bf16 %v534_v55, %v534_v55  ;;  %1462 = vmatpush3.bf16.msra.mxu1 %v1560_v50  ;;  %v544_v0 = vpack.c.bf16 %v536_v57, %v536_v57 }
  0xef   : > { %1441 = vmatprep.subr.bf16.mxu0 %v1561_v51  ;;  %1463 = vmatprep.subr.bf16.mxu1 %v1562_v54 }
  0xf0   : > { %1176 = vmatprep.mubr.bf16.mxu0 %v542_v60  ;;  %1216 = vmatprep.mubr.bf16.mxu1 %v544_v0 }
  0xf2   : > { %1442 = vmatpush3.bf16.msra.mxu0 %v1563_v59  ;;  %1464 = vmatpush3.bf16.msra.mxu1 %v1564_v62 }
  0xf3   : > { %1443 = vmatprep.subr.bf16.mxu0 %v1565_v63  ;;  %1465 = vmatprep.subr.bf16.mxu1 %v1566_v1 }
  0xf6   : > { %1444 = vmatpush3.bf16.msra.mxu0 %v1567_v2  ;;  %1466 = vmatpush3.bf16.msra.mxu1 %v1568_v3 }
  0xf7   : > { %1445 = vmatprep.subr.bf16.mxu0 %v1569_v4  ;;  %1467 = vmatprep.subr.bf16.mxu1 %v1570_v5 }
  0xfa   : > { %1446 = vmatpush3.bf16.msra.mxu0 %v1571_v7  ;;  %1468 = vmatpush3.bf16.msra.mxu1 %v1572_v11 }
  0xfb   : > { %1447 = vmatprep.subr.bf16.mxu0 %v1573_v12  ;;  %1469 = vmatprep.subr.bf16.mxu1 %v1574_v13 }
  0xfe   : > { %1448 = vmatpush3.bf16.msra.mxu0 %v1575_v6  ;;  %1470 = vmatpush3.bf16.msra.mxu1 %v1576_v16 }
  0xff   : > { %1449 = vmatprep.subr.bf16.mxu0 %v1577_v17  ;;  %1471 = vmatprep.subr.bf16.mxu1 %v1578_v18 }
 0x102   : > { %1450 = vmatpush3.bf16.msra.mxu0 %v1579_v8  ;;  %1472 = vmatpush3.bf16.msra.mxu1 %v1580_v21 }
 0x103   : > { %1451 = vmatprep.subr.bf16.mxu0 %v1581_v22  ;;  %1473 = vmatprep.subr.bf16.mxu1 %v1582_v23 }
 0x106   : > { %1452 = vmatpush3.bf16.msra.mxu0 %v1583_v25  ;;  %1474 = vmatpush3.bf16.msra.mxu1 %v1584_v27 }
 0x109   : > { %1177 = vmatmul.mubr.bf16.vlgmr.msra.gmra.mxu0 %v541_v29  ;;  %1217 = vmatmul.mubr.bf16.vlgmr.msra.gmra.mxu1 %v543_v28 }
 0x1a9   : > { %v1409_v30 = vpop.f32.mrf.mxu0  ;;  %v1431_v31 = vpop.f32.mrf.mxu1 }
 0x1ab   : > { %v1410_v32 = vpop.f32.mrf.mxu0  ;;  %v1432_v33 = vpop.f32.mrf.mxu1 }
 0x1ac   : > { %v1411_v38 = vadd.f32 %v1410_v32, %v1409_v30  ;;  %v1433_v42 = vadd.f32 %v1432_v33, %v1431_v31 }
 0x1ad   : > { %v1412_v34 = vpop.f32.mrf.mxu0  ;;  %v1434_v35 = vpop.f32.mrf.mxu1 }
 0x1ae   : > { %v1099_v40 = vadd.f32 %v1411_v38, %v1324_v39 }
 0x1af   : > { %v1413_v36 = vpop.f32.mrf.mxu0  ;;  %v1435_v37 = vpop.f32.mrf.mxu1 }
 0x1b0   : > { %v1139_v45 = vadd.f32 %v1433_v42, %v1099_v40 }
 0x1c9   : > { %v1453_v41 = vpop.f32.mrf.mxu0  ;;  %v1475_v43 = vpop.f32.mrf.mxu1 }
 0x1cb   : > { %v1454_v44 = vpop.f32.mrf.mxu0  ;;  %v1476_v47 = vpop.f32.mrf.mxu1 }
 0x1cc   : > { %v1455_v46 = vadd.f32 %v1454_v44, %v1453_v41  ;;  %v1477_v50 = vadd.f32 %v1476_v47, %v1475_v43 }
 0x1cd   : > { %v1456_v48 = vpop.f32.mrf.mxu0  ;;  %v1478_v51 = vpop.f32.mrf.mxu1 }
 0x1ce   : > { %v1179_v49 = vadd.f32 %v1455_v46, %v1139_v45 }
 0x1cf   : > { %v1457_v52 = vpop.f32.mrf.mxu0  ;;  %v1479_v54 = vpop.f32.mrf.mxu1 }
 0x1d0   : > { %v1219_v53 = vadd.f32 %v1477_v50, %v1179_v49 }
 0x1d2   : > { %1224 = vst [vmem:[%s215_s17] sm:$0xff] %v1219_v53 }
 0x1d3   : > { %1598 = shalt.err (!%p1595_p3)
}
 0x1d4   : > { %s1599_s10 = scalar_lea.hbm %s1237_s6, 128  ;;  %s1603_s13 = scalar_lea.hbm %s2046_s5, 256 }
 0x1d5   : > { %p1600_p4 = scmp.ne.s32.totalorder %s1237_s6, %s1599_s10  ;;  %p1604_p9 = scmp.lt.s32.totalorder %s1237_s6, %s2046_s5 }
 0x1d6   : > { %p1605_p10 = scmp.lt.s32.totalorder %s1603_s13, %s1599_s10 }
 0x1d7   : > { %p1601_p7 = pnand %p1600_p4, %p1717_p5 }
 0x1d8   : > { %p1606_p11 = por %p1605_p10, %p1604_p9 }
 0x1d9   : > { %p1602_p8 = pneg %p1601_p7 }
 0x1db   : > { %p1607_p12 = pnand %p1606_p11, %p1602_p8 }
 0x1dd   : > { %1610 = shalt.err (!%p1607_p12)
}
 0x1de   : > { %1481 = dma.vmem_to_hbm [thread:$0]  (%p1717_p5), %s1240_s23, 128, %s1237_s6, %s1226_s30  }
 0x1df PF: > { %p1487_p13 = scmp.ge.s32.totalorder %s1645_s21, 2  ;;  %s1251_s16 = sand.u32 1, %s1633_s18  }
 0x1e0   : > { %s1252_s17 = scalar_lea.sflag [#allocation3], %s1251_s16 }
 0x1e1   : > { %p1484_p0 = pnand %p1487_p13, %p1721_p6 }
 0x1e3   : > { %p1485_p1 = pneg %p1484_p0 }
 0x1e5   : > { %1628 = dma.done.wait (%p1485_p1), %s1252_s17, 128  }
 0x1e6   : > { %1630 = vsyncadd (%p1485_p1), %s1252_s17, 4294967168  ;;  %p15_p2 = scmp.ge.s32.totalorder %s1704_s24, 4   ;;  %s2049_s18 = smov %s1637_s19 }
 0x1e7   : > { %s2050_s19 = smov %s1641_s20  ;;  %s2051_s20 = smov %s1715_s27 }
 0x1e8   : > { %s2052_s21 = smov %s1704_s24  ;;  %17 = sbr.rel (!%p15_p2) target bundleno = 3 (0x3), region = 75 }
 0x1ed   :  { %1257 = vsyncpa [#allocation3], 1 }
 0x1ee   :  { %1259 = vsyncpa [#allocation3 + $0x1], 1 }

// kernel: decoder_transformer_forward.2
= control target key start
LH: loop header
LB: loop body
LE: loop exit
PB: predicated region body
PF: predicated region fallthrough
CT: control target
= control target key end

     0   :  { %s5001_s29 = smov 0   ;;  %s5003_s30 = smov 0   ;;  %s5592_s0 = inlined_call_operand.vmem [shape: f32[2,16,32], index: 0, kind: input, shape index: {}]   ;;  %s5593_s1 = inlined_call_operand.vmem [shape: f32[16,16], index: 1, kind: input, shape index: {}]   ;;  %s5594_s2 = inlined_call_operand.vmem [shape: bf16[2,32,96], index: 2, kind: input, shape index: {}]   ;;  %s5595_s3 = inlined_call_operand.vmem [shape: f32[2,1,96], index: 3, kind: input, shape index: {}]   ;;  %s5596_s4 = inlined_call_operand.vmem [shape: bf16[2,32,32], index: 4, kind: input, shape index: {}]   ;;  %s5597_s5 = inlined_call_operand.vmem [shape: f32[2,1,32], index: 5, kind: input, shape index: {}]   ;;  %s5598_s6 = inlined_call_operand.vmem [shape: f32[2,1,32], index: 6, kind: input, shape index: {}]   ;;  %s5599_s7 = inlined_call_operand.vmem [shape: f32[2,1,32], index: 7, kind: input, shape index: {}]   ;;  %s5600_s8 = inlined_call_operand.vmem [shape: f32[2,1,32], index: 8, kind: input, shape index: {}]   ;;  %s5601_s9 = inlined_call_operand.vmem [shape: f32[2,1,32], index: 9, kind: input, shape index: {}]   ;;  %s5602_s10 = inlined_call_operand.vmem [shape: bf16[2,32,2048], index: 10, kind: input, shape index: {}]   ;;  %s5603_s11 = inlined_call_operand.vmem [shape: f32[2,1,2048], index: 11, kind: input, shape index: {}]   ;;  %s5604_s12 = inlined_call_operand.vmem [shape: bf16[2,2048,32], index: 12, kind: input, shape index: {}]   ;;  %s5605_s13 = inlined_call_operand.vmem [shape: f32[2,1,32], index: 13, kind: input, shape index: {}]   ;;  %s5606_s14 = inlined_call_operand.vmem [shape: f32[2,16,32], index: 14, kind: output, shape index: {}]  }
   0x1   :  { %5613 = sst [smem:[#allocation10_spill]] %s5592_s0  ;;  %s5005_s15 = smov 0  }
   0x2   :  { %5614 = sst [smem:[#allocation11_spill]] %s5593_s1  ;;  %s5007_s16 = smov 0  }
   0x3   :  { %5615 = sst [smem:[#allocation12_spill]] %s5594_s2  ;;  %s5009_s17 = smov 0  }
   0x4   :  { %5616 = sst [smem:[#allocation13_spill]] %s5596_s4 }
   0x5   :  { %5617 = sst [smem:[#allocation14_spill]] %s5605_s13 }
   0x6   :  { %5618 = sst [smem:[#allocation15_spill]] %s5606_s14 }
   0x7 LB: > { %5619 = sst [smem:[#allocation3_spill]] %s4894_s29  ;;  %s33_s18 = sadd.s32 1, %s4902_s15  ;;  %s4910_s17 = sphi %s5009_s17, %s24_s17   ;;  %s4906_s16 = sphi %s5007_s16, %s5646_s16   ;;  %s4902_s15 = sphi %s5005_s15, %s5645_s15   ;;  %s4898_s30 = sphi %s5003_s30, %s5644_s30   ;;  %s4894_s29 = sphi %s5001_s29, %s5643_s29  }
   0x8   : > { %5620 = sst [smem:[#allocation4_spill]] %s4902_s15  ;;  %s36_s19 = sadd.s32 1, %s4906_s16 }
   0x9   : > { %5621 = sst [smem:[#allocation5_spill]] %s4906_s16  ;;  %p34_p0 = scmp.ge.s32.totalorder %s33_s18, 2 }
   0xa   : > { %5622 = sst [smem:[#allocation6_spill]] %s4910_s17  ;;  %p4109_p1 = scmp.ge.s32.totalorder %s4910_s17, 1 }
   0xb   : > { %p529_p2 = scmp.lt.s32.totalorder %s4910_s17, 5  ;;  %s5648_s18 = smov (%p34_p0, %s33_s18), 0 }
   0xc   : > { %5623 = sst [smem:[#allocation7_spill]] %s5648_s18  ;;  %s5650_s19 = smov (!%p34_p0, %s36_s19), %s4906_s16 }
   0xd   : > { %p530_p3 = pnand %p4109_p1, %p529_p2  ;;  %p38_p4 = scmp.ge.s32.totalorder %s5650_s19, 2 }
   0xf   : > { %s5652_s19 = smov (%p38_p4, %s5650_s19), 0  ;;  %533 = sbr.rel (%p530_p3) target bundleno = 3662 (0xe4e), region = 76 }
  0x10   : > { %5624 = sst [smem:[#allocation8_spill]] %s5652_s19 }
  0x14   : > { %p620_p5 = scmp.lt.s32.totalorder %s4898_s30, 1  ;;  %p625_p6 = scmp.lt.s32.totalorder %s4894_s29, 1 }
  0x15   : > { %s5625_s0 = sld [smem:[#allocation10_spill]] }
  0x16   : > { %s5654_s30 = smov (!%p620_p5, %s4898_s30), 1  ;;  %s5626_s2 = sld [smem:[#allocation12_spill]] }
  0x17   : > { %s5035_s20 = scalar_select %p625_p6, %s4894_s29, 1 }
  0x18   : > { %s4333_s21 = sshll.u32 %s5654_s30, 4  ;;  %s5627_s4 = sld [smem:[#allocation13_spill]] }
  0x19   : > { %s4334_s25 = sshll.u32 %s5035_s20, 4  ;;  %s4337_s13 = sshll.u32 %s5035_s20, 10 }
  0x1a   : > { %s5077_s30 = scalar_lea.vmem %s5603_s11, %s4334_s25  ;;  %s5629_s15 = sld [smem:[#allocation14_spill]] }
  0x1b   : > { %s624_s24 = scalar_lea.vmem %s5625_s0, %s4333_s21  ;;  %s5631_s29 = sld [smem:[#allocation3_spill]] }
  0x1c   : > { %s629_s28 = scalar_lea.vmem %s5626_s2, %s4334_s25  ;;  %s5088_s2 = scalar_lea.vmem %s5604_s12, %s4337_s13 }
  0x1e   : > { %s5051_s1 = scalar_lea.vmem %s5627_s4, %s4334_s25  ;;  %s4336_s4 = sshll.u32 %s5035_s20, 8 }
  0x1f   : > { %5628 = sst [smem:[#allocation9_spill]] %s5051_s1  ;;  %s5082_s14 = scalar_lea.vmem %s5602_s10, %s4336_s4 }
  0x20   : > { %s669_s17 = scalar_lea.vmem %s5629_s15, %s5035_s20  ;;  %s5630_s1 = sld [smem:[#allocation15_spill]] }
  0x21   : > { %p4123_p7 = scmp.ne.s32.totalorder %s5631_s29, 0 }
  0x23   : > { %679 = sbr.rel (%p4123_p7) target bundleno = 42 (0x2a), region = 80 }
  0x26   : > { %s5097_s25 = scalar_lea.vmem %s5630_s1, %s4333_s21 }
  0x28   : > { %v680_v0 = vld [vmem:[%s624_s24] sm:$0xff]  ;;  %vm682_vm0 = vcmask 261120   ;;  %v681_v1 = vld [vmem:[%s624_s24 + $0x8] sm:$0xff] }
  0x29   : > { %683 = vst.msk [vmem:[#allocation2] sm:$0xff] %vm682_vm0, %v680_v0  ;;  %684 = vst.msk [vmem:[#allocation2 + $0x8] sm:$0xff] %vm682_vm0, %v681_v1 }
  0x2a PF: > { %v4700_v2 = vld [vmem:[%s629_s28 + $0x8] sm:$0xff]   ;;  %v4912_v3 = vmov 0.0   ;;  %v4701_v4 = vld [vmem:[%s629_s28] sm:$0xff]   ;;  %vm4913_vm1 = vmmov 0   ;;  %vm713_vm2 = vcmask 261120   ;;  %s5632_s24 = scalar_lea.vmem %s5595_s3, %s5035_s20  ;;  %vm768_vm3 = vcmask 64512   ;;  %s5635_s19 = scalar_lea.vmem %s5597_s5, %s5035_s20 }
  0x2b   : > { %4558 = vmatprep.subr.bf16.mxu0 %v4912_v3  ;;  %4562 = vmatprep.mubr.msk.bf16.mxu0 %vm4913_vm1, %v4912_v3  ;;  %v4124_v8 = vld [vmem:[%s5632_s24] ss:$0 sm:$0xff]  ;;  %s4914_s28 = smov 88   ;;  %s4915_s22 = smov 96   ;;  %vm856_vm4 = vcmask 130048   ;;  %vm1175_vm5 = vcmask 1043456  }
  0x2c   : > { %4559 = vmatpush3.bf16.msra.mxu0 %v4700_v2  ;;  %s4916_s27 = smov 120   ;;  %s5633_s23 = sld [smem:[#allocation11_spill]] }
  0x2d   : > { %4560 = vmatprep.subr.bf16.mxu0 %v4912_v3  ;;  %s4917_s18 = smov 64   ;;  %s4918_s16 = smov 56  }
  0x2e   : > { %s5634_s15 = sld [smem:[#allocation9_spill]]  ;;  %s4919_s1 = smov 80  }
  0x2f   : > { %s4920_s29 = smov 112   ;;  %s4921_s4 = smov 48  }
  0x30   : > { %v685_v5 = vld [vmem:[#allocation2] sm:$0xff]  ;;  %v686_v6 = vld [vmem:[#allocation2 + $0x8] sm:$0xff]  ;;  %4561 = vmatpush3.bf16.msra.mxu0 %v4701_v4  ;;  %s4922_s21 = smov 72   ;;  %s4923_s24 = smov 104  }
  0x31   : > { %v689_v7 = vpack.c.bf16 %v686_v6, %v685_v5  ;;  %s5636_s26 = scalar_lea.vmem %s5598_s6, %s5035_s20 }
  0x32   : > { %v5140_v22 = vld [vmem:[%s5633_s23 + $0x8] sm:$0xff]  ;;  %v5145_v26 = vld [vmem:[%s5633_s23] sm:$0xff] }
  0x33   : > { %4563 = vmatmul.mubr.msk.bf16.vlgmr.msra.gmra.mxu0 %vm713_vm2, %v689_v7 }
  0x34   : > { %v759_v60 = vld [vmem:[%s5634_s15 + $0x4] sm:$0xf] }
  0x35   : > { %v1177_v61 = vsel %vm1175_vm5, %v759_v60, 0 }
  0xf3   : > { %v751_v9 = vpop.f32.mrf.mxu0 }
  0xf4   : > { %v5110_v10 = vadd.f32 %v4124_v8, %v751_v9 }
  0xf5   : > { %v4564_v11 = vpop.f32.mrf.mxu0 }
  0xf6   : > { %4570 = vmatprep.mubr.msk.f32.mxu1 %vm768_vm3, %v5110_v10 }
  0xf7   : > { %v754_v12 = vpop.f32.mrf.mxu0 }
  0xf8   : > { %v5114_v13 = vadd.f32 %v4124_v8, %v754_v12 }
  0xf9   : > { %v4565_v14 = vpop.f32.mrf.mxu0 }
  0xfa   : > { %973 = vrot.lane.b32.xlu1 %v5114_v13, %s4914_s28  ;;  %766 = vrot.lane.b32.xlu0 %v5114_v13, %s4915_s22 }
  0xfe   : > { %971 = vrot.lane.b32.xlu1 %v5110_v10, %s4914_s28  ;;  %764 = vrot.lane.b32.xlu0 %v5110_v10, %s4915_s22  ;;  %s4924_s28 = smov 40  }
 0x102   : > { %969 = vrot.lane.b32.xlu1 %v5114_v13, %s4916_s27  ;;  %967 = vrot.lane.b32.xlu0 %v5110_v10, %s4916_s27 }
 0x16c   : > { %v974_v15 = vpop.permute.xlu1 %973  ;;  %v767_v16 = vpop.permute.xlu0 %766 }
 0x16d   : > { %4566 = vmatprep.subr.msk.mxu1 %vm768_vm3, %v767_v16  ;;  %4580 = vmatprep.subr.msk.mxu0 %vm768_vm3, %v974_v15 }
 0x16e   : > { %4567 = vmatpush3.xpose.msk.msra.mxu1 %vm768_vm3, %v767_v16  ;;  %4581 = vmatpush3.xpose.msk.msra.mxu0 %vm768_vm3, %v974_v15 }
 0x170   : > { %v972_v17 = vpop.permute.xlu1 %971  ;;  %v765_v18 = vpop.permute.xlu0 %764 }
 0x171   : > { %4568 = vmatprep.subr.msk.mxu1 %vm768_vm3, %v765_v18  ;;  %4582 = vmatprep.subr.msk.mxu0 %vm768_vm3, %v972_v17 }
 0x172   : > { %4569 = vmatpush3.xpose.msk.msra.mxu1 %vm768_vm3, %v765_v18  ;;  %4583 = vmatpush3.xpose.msk.msra.mxu0 %vm768_vm3, %v972_v17  ;;  %v758_v17 = vld [vmem:[%s5634_s15] sm:$0xf] }
 0x173   : > { %4594 = vmatprep.subr.bf16.mxu0 %v4912_v3  ;;  %v1224_v18 = vsel %vm1175_vm5, %v758_v17, 0 }
 0x174   : > { %v970_v19 = vpop.permute.xlu1 %969  ;;  %v968_v20 = vpop.permute.xlu0 %967 }
 0x175   : > { %4571 = vmatmul.mubr.msk.f32.vlgmr.msra.gmra.mxu1 %vm768_vm3, %v5114_v13  ;;  %4584 = vmatprep.mubr.msk.f32.mxu0 %vm768_vm3, %v968_v20 }
 0x176   : > { %4585 = vmatmul.mubr.msk.f32.vlgmr.msra.gmra.mxu0 %vm768_vm3, %v970_v19 }
 0x177   : > { %4596 = vmatprep.mubr.msk.bf16.mxu0 %vm4913_vm1, %v4912_v3  ;;  %4595 = vmatpush3.bf16.msra.mxu0 %v1177_v61 }
 0x235   : > { %v4572_v21 = vpop.f32.mrf.mxu1 }
 0x236   : > { %v853_v23 = vmul.f32 0.35355338, %v4572_v21  ;;  %v4586_v24 = vpop.f32.mrf.mxu0 }
 0x237   : > { %v843_v25 = vpop.f32.mrf.mxu1  ;;  %v1059_v33 = vmul.f32 0.35355338, %v4586_v24 }
 0x238   : > { %v852_v27 = vmul.f32 0.35355338, %v843_v25  ;;  %v1049_v28 = vpop.f32.mrf.mxu0  ;;  %v855_v29 = vadd.f32 %v853_v23, %v5140_v22 }
 0x239   : > { %v1058_v30 = vmul.f32 0.35355338, %v1049_v28  ;;  %v1061_v37 = vadd.f32 %v1059_v33, %v5140_v22 }
 0x23a   : > { %v860_v31 = vsel %vm856_vm4, %v855_v29, -inf  ;;  %v854_v32 = vadd.f32 %v852_v27, %v5145_v26 }
 0x23b   : > { %861 = vmax.xlane.f32.xlu1 %v860_v31  ;;  %v1060_v35 = vadd.f32 %v1058_v30, %v5145_v26  ;;  %v1065_v38 = vsel %vm856_vm4, %v1061_v37, -inf }
 0x23c   : > { %v857_v34 = vsel %vm856_vm4, %v854_v32, -inf }
 0x23d   : > { %858 = vmax.xlane.f32.xlu0 %v857_v34  ;;  %v1062_v36 = vsel %vm856_vm4, %v1060_v35, -inf }
 0x241   : > { %1063 = vmax.xlane.f32.xlu0 %v1062_v36 }
 0x245   : > { %1066 = vmax.xlane.f32.xlu0 %v1065_v38 }
 0x24c   : > { %881 = vrot.lane.b32.xlu1 %v5114_v13, %s4917_s18 }
 0x250   : > { %1086 = vrot.lane.b32.xlu1 %v5114_v13, %s4918_s16 }
 0x2c4   : > { %v862_v39 = vpop.xlane.xlu1 %861 }
 0x2c5   : > { %v864_v40 = vsub.f32 %v855_v29, %v862_v39 }
 0x2c6   : > { %v859_v41 = vpop.xlane.xlu0 %858 }
 0x2c7   : > { %v867_v42 = vmul.f32 1.442695, %v864_v40  ;;  %v863_v43 = vsub.f32 %v854_v32, %v859_v41 }
 0x2c8   : > { %v882_v44 = vpop.permute.xlu1 %881 }
 0x2c9   : > { %4830 = vpow2.f32 %v867_v42  ;;  %v865_v45 = vmul.f32 1.442695, %v863_v43  ;;  %4573 = vmatprep.subr.mxu1 %v882_v44 }
 0x2ca   : > { %4574 = vmatpush3.msra.mxu1 %v882_v44  ;;  %v1064_v46 = vpop.xlane.xlu0 %1063 }
 0x2cb   : > { %4832 = vpow2.f32 %v865_v45  ;;  %v1068_v47 = vsub.f32 %v1060_v35, %v1064_v46 }
 0x2cc   : > { %v1087_v62 = vpop.permute.xlu1 %1086 }
 0x2cd   : > { %v1070_v48 = vmul.f32 1.442695, %v1068_v47 }
 0x2ce   : > { %v1067_v49 = vpop.xlane.xlu0 %1066 }
 0x2cf   : > { %4834 = vpow2.f32 %v1070_v48  ;;  %v1069_v50 = vsub.f32 %v1061_v37, %v1067_v49 }
 0x2d1   : > { %v1072_v51 = vmul.f32 1.442695, %v1069_v50 }
 0x2d3   : > { %4836 = vpow2.f32 %v1072_v51 }
 0x2d6   : > { %v4831_v52 = vpop.eup %4830 }
 0x2d7   : > { %v872_v53 = vsel %vm856_vm4, %v4831_v52, 0.0 }
 0x2d8   : > { %v4833_v54 = vpop.eup %4832  ;;  %873 = vadd.xlane.f32.xlu0 %v872_v53 }
 0x2d9   : > { %v869_v55 = vsel %vm856_vm4, %v4833_v54, 0.0 }
 0x2da   : > { %870 = vadd.xlane.f32.xlu1 %v869_v55 }
 0x2dc   : > { %v4835_v56 = vpop.eup %4834 }
 0x2dd   : > { %v1074_v57 = vsel %vm856_vm4, %v4835_v56, 0.0 }
 0x2de   : > { %1075 = vadd.xlane.f32.xlu1 %v1074_v57 }
 0x2e0   : > { %v4837_v58 = vpop.eup %4836 }
 0x2e1   : > { %v1077_v59 = vsel %vm856_vm4, %v4837_v58, 0.0 }
 0x2e2   : > { %1078 = vadd.xlane.f32.xlu0 %v1077_v59 }
 0x2ef   : > { %1084 = vrot.lane.b32.xlu1 %v5110_v10, %s4918_s16 }
 0x2f3   : > { %1271 = vrot.lane.b32.xlu1 %v5110_v10, %s4919_s1 }
 0x2f7   : > { %1269 = vrot.lane.b32.xlu1 %v5114_v13, %s4920_s29 }
 0x2f8   : > { %879 = vrot.lane.b32.xlu0 %v5110_v10, %s4917_s18 }
 0x2fc   : > { %1273 = vrot.lane.b32.xlu0 %v5114_v13, %s4919_s1 }
 0x300   : > { %1267 = vrot.lane.b32.xlu0 %v5110_v10, %s4920_s29  ;;  %s5639_s29 = scalar_lea.vmem %s5600_s8, %s5035_s20 }
 0x361   : > { %v874_v63 = vpop.xlane.xlu0 %873 }
 0x362   : > { %4838 = vrcp.f32 %v874_v63 }
 0x363   : > { %v871_v0 = vpop.xlane.xlu1 %870 }
 0x364   : > { %4840 = vrcp.f32 %v871_v0 }
 0x367   : > { %v1076_v1 = vpop.xlane.xlu1 %1075 }
 0x368   : > { %4842 = vrcp.f32 %v1076_v1 }
 0x36b   : > { %v1079_v2 = vpop.xlane.xlu0 %1078  ;;  %v1085_v12 = vpop.permute.xlu1 %1084 }
 0x36c   : > { %4844 = vrcp.f32 %v1079_v2 }
 0x36f   : > { %v880_v4 = vpop.permute.xlu0 %879  ;;  %v4839_v5 = vpop.eup %4838 }
 0x370   : > { %4575 = vmatprep.subr.mxu1 %v880_v4  ;;  %v878_v9 = vmul.f32 %v4839_v5, %v4831_v52  ;;  %v1272_v28 = vpop.permute.xlu1 %1271 }
 0x371   : > { %v4841_v6 = vpop.eup %4840  ;;  %4576 = vmatpush3.msra.mxu1 %v880_v4 }
 0x372   : > { %4587 = vmatprep.subr.mxu1 %v1087_v62  ;;  %v877_v7 = vmul.f32 %v4841_v6, %v4833_v54 }
 0x373   : > { %v1274_v8 = vpop.permute.xlu0 %1273 }
 0x374   : > { %4577 = vmatprep.mubr.msk.f32.mxu1 %vm856_vm4, %v877_v7  ;;  %4606 = vmatprep.subr.msk.mxu0 %vm768_vm3, %v1274_v8  ;;  %v1270_v29 = vpop.permute.xlu1 %1269  ;;  %v760_v7 = vld [vmem:[%s5634_s15 + $0x8] sm:$0xf] }
 0x375   : > { %v4843_v11 = vpop.eup %4842  ;;  %4578 = vmatmul.mubr.msk.f32.vlgmr.msra.gmra.mxu1 %vm856_vm4, %v878_v9 }
 0x376   : > { %4588 = vmatpush3.msra.mxu1 %v1087_v62  ;;  %v1082_v14 = vmul.f32 %v4843_v11, %v4835_v56 }
 0x377   : > { %4589 = vmatprep.subr.mxu1 %v1085_v12  ;;  %v1268_v27 = vpop.permute.xlu0 %1267 }
 0x378   : > { %4590 = vmatpush3.msra.mxu1 %v1085_v12  ;;  %4591 = vmatprep.mubr.msk.f32.mxu1 %vm856_vm4, %v1082_v14 }
 0x379   : > { %v4845_v15 = vpop.eup %4844  ;;  %4600 = vmatprep.subr.bf16.mxu1 %v4912_v3 }
 0x37a   : > { %v1083_v16 = vmul.f32 %v4845_v15, %v4837_v58 }
 0x37c   : > { %4592 = vmatmul.mubr.msk.f32.vlgmr.msra.gmra.mxu1 %vm856_vm4, %v1083_v16 }
 0x37d   : > { %4602 = vmatprep.mubr.msk.bf16.mxu1 %vm4913_vm1, %v4912_v3  ;;  %4601 = vmatpush3.bf16.msra.mxu1 %v1224_v18 }
 0x435   : > { %v4579_v19 = vpop.f32.mrf.mxu1 }
 0x437   : > { %v957_v20 = vpop.f32.mrf.mxu1 }
 0x438   : > { %v966_v21 = vpack.c.bf16 %v4579_v19, %v957_v20 }
 0x43a   : > { %4603 = vmatmul.mubr.msk.bf16.vlgmr.msra.gmra.mxu1 %vm768_vm3, %v966_v21 }
 0x43c   : > { %v4593_v23 = vpop.f32.mrf.mxu1 }
 0x43e   : > { %v1162_v24 = vpop.f32.mrf.mxu1 }
 0x43f   : > { %v1171_v25 = vpack.c.bf16 %v4593_v23, %v1162_v24 }
 0x441   : > { %4597 = vmatmul.mubr.msk.bf16.vlgmr.msra.gmra.mxu0 %vm768_vm3, %v1171_v25 }
 0x442   : > { %4607 = vmatpush3.xpose.msk.msra.mxu0 %vm768_vm3, %v1274_v8  ;;  %4610 = vmatprep.mubr.msk.f32.mxu0 %vm768_vm3, %v1268_v27  ;;  %v1476_v8 = vsel %vm1175_vm5, %v760_v7, 0 }
 0x443   : > { %4608 = vmatprep.subr.msk.mxu0 %vm768_vm3, %v1272_v28 }
 0x446   : > { %4609 = vmatpush3.xpose.msk.msra.mxu0 %vm768_vm3, %v1272_v28 }
 0x447   : > { %4620 = vmatprep.subr.bf16.mxu0 %v4912_v3 }
 0x449   : > { %4611 = vmatmul.mubr.msk.f32.vlgmr.msra.gmra.mxu0 %vm768_vm3, %v1270_v29 }
 0x44a   : > { %4622 = vmatprep.mubr.msk.bf16.mxu0 %vm4913_vm1, %v4912_v3  ;;  %4621 = vmatpush3.bf16.msra.mxu0 %v1476_v8 }
 0x4fa   : > { %v1260_v30 = vpop.f32.mrf.mxu1 }
 0x4fc   : > { %v4604_v31 = vpop.f32.mrf.mxu1 }
 0x4fe   : > { %v1263_v32 = vpop.f32.mrf.mxu1 }
 0x500   : > { %v4605_v33 = vpop.f32.mrf.mxu1 }
 0x501   : > { %v1213_v34 = vpop.f32.mrf.mxu0 }
 0x502   : > { %v5193_v35 = vadd.f32 %v1260_v30, %v1213_v34 }
 0x503   : > { %v4598_v36 = vpop.f32.mrf.mxu0 }
 0x505   : > { %v1216_v37 = vpop.f32.mrf.mxu0 }
 0x506   : > { %v5195_v38 = vadd.f32 %v1263_v32, %v1216_v37 }
 0x507   : > { %v4599_v39 = vpop.f32.mrf.mxu0 }
 0x509   : > { %v4612_v40 = vpop.f32.mrf.mxu0 }
 0x50a   : > { %v1359_v41 = vmul.f32 0.35355338, %v4612_v40 }
 0x50b   : > { %v1349_v42 = vpop.f32.mrf.mxu0 }
 0x50c   : > { %v1358_v43 = vmul.f32 0.35355338, %v1349_v42  ;;  %v1361_v44 = vadd.f32 %v1359_v41, %v5140_v22 }
 0x50e   : > { %v1365_v45 = vsel %vm856_vm4, %v1361_v44, -inf  ;;  %v1360_v46 = vadd.f32 %v1358_v43, %v5145_v26 }
 0x50f   : > { %1366 = vmax.xlane.f32.xlu1 %v1365_v45 }
 0x510   : > { %v1362_v47 = vsel %vm856_vm4, %v1360_v46, -inf }
 0x511   : > { %1363 = vmax.xlane.f32.xlu0 %v1362_v47 }
 0x520   : > { %1386 = vrot.lane.b32.xlu1 %v5114_v13, %s4921_s4 }
 0x524   : > { %1527 = vrot.lane.b32.xlu1 %v5114_v13, %s4922_s21 }
 0x528   : > { %1525 = vrot.lane.b32.xlu1 %v5110_v10, %s4922_s21 }
 0x52c   : > { %1523 = vrot.lane.b32.xlu1 %v5114_v13, %s4923_s24 }
 0x598   : > { %v1367_v48 = vpop.xlane.xlu1 %1366 }
 0x599   : > { %v1369_v49 = vsub.f32 %v1361_v44, %v1367_v48 }
 0x59a   : > { %v1364_v50 = vpop.xlane.xlu0 %1363 }
 0x59b   : > { %v1372_v51 = vmul.f32 1.442695, %v1369_v49  ;;  %v1368_v52 = vsub.f32 %v1360_v46, %v1364_v50  ;;  %v4156_v49 = vld [vmem:[%s5635_s19] ss:$0 sm:$0xff] }
 0x59c   : > { %v1387_v53 = vpop.permute.xlu1 %1386 }
 0x59d   : > { %4846 = vpow2.f32 %v1372_v51  ;;  %v1370_v54 = vmul.f32 1.442695, %v1368_v52  ;;  %4613 = vmatprep.subr.mxu1 %v1387_v53 }
 0x59e   : > { %4614 = vmatpush3.msra.mxu1 %v1387_v53 }
 0x59f   : > { %4848 = vpow2.f32 %v1370_v54 }
 0x5a0   : > { %v1528_v62 = vpop.permute.xlu1 %1527 }
 0x5a4   : > { %v1526_v5 = vpop.permute.xlu1 %1525 }
 0x5a8   : > { %v1524_v6 = vpop.permute.xlu1 %1523 }
 0x5aa   : > { %v4847_v55 = vpop.eup %4846 }
 0x5ab   : > { %v1377_v56 = vsel %vm856_vm4, %v4847_v55, 0.0 }
 0x5ac   : > { %v4849_v57 = vpop.eup %4848  ;;  %1378 = vadd.xlane.f32.xlu0 %v1377_v56 }
 0x5ad   : > { %v1374_v58 = vsel %vm856_vm4, %v4849_v57, 0.0 }
 0x5b0   : > { %1375 = vadd.xlane.f32.xlu0 %v1374_v58 }
 0x5c6   : > { %1384 = vrot.lane.b32.xlu0 %v5110_v10, %s4921_s4 }
 0x5ca   : > { %1521 = vrot.lane.b32.xlu0 %v5110_v10, %s4923_s24  ;;  %s5640_s24 = scalar_lea.vmem %s5601_s9, %s5035_s20 }
 0x635   : > { %v1379_v59 = vpop.xlane.xlu0 %1378 }
 0x636   : > { %4850 = vrcp.f32 %v1379_v59 }
 0x639   : > { %v1376_v60 = vpop.xlane.xlu0 %1375 }
 0x63a   : > { %4852 = vrcp.f32 %v1376_v60  ;;  %v4871_v60 = vld [vmem:[#allocation2 + $0x8] sm:$0xff] }
 0x63d   : > { %v1385_v61 = vpop.permute.xlu0 %1384 }
 0x63e   : > { %4615 = vmatprep.subr.mxu1 %v1385_v61 }
 0x63f   : > { %4616 = vmatpush3.msra.mxu1 %v1385_v61 }
 0x640   : > { %4626 = vmatprep.subr.msk.mxu1 %vm768_vm3, %v1528_v62 }
 0x641   : > { %v1522_v4 = vpop.permute.xlu0 %1521 }
 0x643   : > { %v4851_v63 = vpop.eup %4850 }
 0x644   : > { %v1383_v2 = vmul.f32 %v4851_v63, %v4847_v55  ;;  %v4870_v55 = vld [vmem:[#allocation2] sm:$0xff] }
 0x647   : > { %v4853_v0 = vpop.eup %4852 }
 0x648   : > { %v1382_v1 = vmul.f32 %v4853_v0, %v4849_v57 }
 0x64a   : > { %4617 = vmatprep.mubr.msk.f32.mxu1 %vm856_vm4, %v1382_v1 }
 0x64b   : > { %4618 = vmatmul.mubr.msk.f32.vlgmr.msra.gmra.mxu1 %vm856_vm4, %v1383_v2 }
 0x64c   : > { %4627 = vmatpush3.xpose.msk.msra.mxu1 %vm768_vm3, %v1528_v62  ;;  %4630 = vmatprep.mubr.msk.f32.mxu1 %vm768_vm3, %v1522_v4 }
 0x64d   : > { %4628 = vmatprep.subr.msk.mxu1 %vm768_vm3, %v1526_v5 }
 0x650   : > { %4629 = vmatpush3.xpose.msk.msra.mxu1 %vm768_vm3, %v1526_v5 }
 0x651   : > { %4640 = vmatprep.subr.bf16.mxu1 %v4912_v3 }
 0x653   : > { %4631 = vmatmul.mubr.msk.f32.vlgmr.msra.gmra.mxu1 %vm768_vm3, %v1524_v6 }
 0x654   : > { %4642 = vmatprep.mubr.msk.bf16.mxu1 %vm4913_vm1, %v4912_v3 }
 0x70b   : > { %v4619_v9 = vpop.f32.mrf.mxu1 }
 0x70d   : > { %v1462_v11 = vpop.f32.mrf.mxu1 }
 0x70e   : > { %v1471_v12 = vpack.c.bf16 %v4619_v9, %v1462_v11  ;;  %v1848_v11 = vld [vmem:[%s5082_s14 + $0x80] sm:$0xff] }
 0x710   : > { %4623 = vmatmul.mubr.msk.bf16.vlgmr.msra.gmra.mxu0 %vm768_vm3, %v1471_v12  ;;  %v1856_v12 = vld [vmem:[%s5082_s14 + $0xc0] sm:$0xff] }
 0x713   : > { %v4632_v14 = vpop.f32.mrf.mxu1 }
 0x714   : > { %v1613_v15 = vmul.f32 0.35355338, %v4632_v14  ;;  %v1849_v14 = vld [vmem:[%s5082_s14 + $0x88] sm:$0xff] }
 0x715   : > { %v1603_v16 = vpop.f32.mrf.mxu1 }
 0x716   : > { %v1612_v17 = vmul.f32 0.35355338, %v1603_v16  ;;  %v1615_v18 = vadd.f32 %v1613_v15, %v5140_v22  ;;  %v4176_v15 = vcombine.high %v1848_v11, %v1856_v12  ;;  %v1857_v16 = vld [vmem:[%s5082_s14 + $0xc8] sm:$0xff] }
 0x718   : > { %v1619_v19 = vsel %vm856_vm4, %v1615_v18, -inf  ;;  %v1614_v20 = vadd.f32 %v1612_v17, %v5145_v26  ;;  %v4175_v17 = vcombine.low %v1848_v11, %v1856_v12  ;;  %v1854_v11 = vld [vmem:[%s5082_s14 + $0xb0] sm:$0xff] }
 0x719   : > { %1620 = vmax.xlane.f32.xlu1 %v1619_v19  ;;  %v4178_v19 = vcombine.high %v1849_v14, %v1857_v16  ;;  %v1862_v12 = vld [vmem:[%s5082_s14 + $0xf0] sm:$0xff] }
 0x71a   : > { %v1616_v3 = vsel %vm856_vm4, %v1614_v20, -inf }
 0x71b   : > { %1617 = vmax.xlane.f32.xlu0 %v1616_v3  ;;  %v1840_v3 = vld [vmem:[%s5082_s14 + $0x40] sm:$0xff] }
 0x72a   : > { %1640 = vrot.lane.b32.xlu1 %v5114_v13, %s4924_s28 }
 0x7a2   : > { %v1621_v21 = vpop.xlane.xlu1 %1620 }
 0x7a3   : > { %v1623_v23 = vsub.f32 %v1615_v18, %v1621_v21  ;;  %v4177_v18 = vcombine.low %v1849_v14, %v1857_v16  ;;  %v1833_v21 = vld [vmem:[%s5082_s14 + $0x8] sm:$0xff]  ;;  %v1855_v14 = vld [vmem:[%s5082_s14 + $0xb8] sm:$0xff] }
 0x7a4   : > { %v1618_v24 = vpop.xlane.xlu0 %1617 }
 0x7a5   : > { %v1626_v25 = vmul.f32 1.442695, %v1623_v23  ;;  %v1622_v27 = vsub.f32 %v1614_v20, %v1618_v24  ;;  %v1832_v20 = vld [vmem:[%s5082_s14] sm:$0xff]  ;;  %v1841_v24 = vld [vmem:[%s5082_s14 + $0x48] sm:$0xff] }
 0x7a6   : > { %v1641_v28 = vpop.permute.xlu1 %1640  ;;  %v4160_v23 = vcombine.high %v1832_v20, %v1840_v3 }
 0x7a7   : > { %4854 = vpow2.f32 %v1626_v25  ;;  %v1624_v29 = vmul.f32 1.442695, %v1622_v27  ;;  %4633 = vmatprep.subr.mxu0 %v1641_v28  ;;  %v4159_v25 = vcombine.low %v1832_v20, %v1840_v3  ;;  %v4161_v27 = vcombine.low %v1833_v21, %v1841_v24  ;;  %v1838_v20 = vld [vmem:[%s5082_s14 + $0x30] sm:$0xff] }
 0x7a8   : > { %4634 = vmatpush3.msra.mxu0 %v1641_v28  ;;  %v4162_v28 = vcombine.high %v1833_v21, %v1841_v24  ;;  %v1846_v3 = vld [vmem:[%s5082_s14 + $0x70] sm:$0xff]  ;;  %v1839_v21 = vld [vmem:[%s5082_s14 + $0x38] sm:$0xff]  ;;  %v4187_v24 = vcombine.low %v1854_v11, %v1862_v12 }
 0x7a9   : > { %4856 = vpow2.f32 %v1624_v29  ;;  %v1850_v29 = vld [vmem:[%s5082_s14 + $0x90] sm:$0xff] }
 0x7b4   : > { %v4855_v22 = vpop.eup %4854 }
 0x7b5   : > { %v1631_v26 = vsel %vm856_vm4, %v4855_v22, 0.0 }
 0x7b6   : > { %v4857_v30 = vpop.eup %4856  ;;  %1632 = vadd.xlane.f32.xlu0 %v1631_v26  ;;  %v1851_v26 = vld [vmem:[%s5082_s14 + $0x98] sm:$0xff] }
 0x7b7   : > { %v1628_v31 = vsel %vm856_vm4, %v4857_v30, 0.0 }
 0x7ba   : > { %1629 = vadd.xlane.f32.xlu0 %v1628_v31  ;;  %v1859_v31 = vld [vmem:[%s5082_s14 + $0xd8] sm:$0xff] }
 0x7d0   : > { %1638 = vrot.lane.b32.xlu0 %v5110_v10, %s4924_s28  ;;  %v1512_v13 = vpop.f32.mrf.mxu0  ;;  %s5641_s28 = sld [smem:[#allocation3_spill]] }
 0x7d1   : > { %v1519_v32 = vadd.f32 %v1512_v13, %v5193_v35  ;;  %v761_v35 = vld [vmem:[%s5634_s15 + $0xc] sm:$0xf]  ;;  %v4925_v13 = vmov 0   ;;  %s5637_s15 = scalar_lea.vmem %s5599_s7, %s5035_s20 }
 0x7d2   : > { %v4624_v33 = vpop.f32.mrf.mxu0 }
 0x7d3   : > { %v4181_v33 = vcombine.low %v1851_v26, %v1859_v31 }
 0x7d4   : > { %v1515_v34 = vpop.f32.mrf.mxu0 }
 0x7d5   : > { %v1520_v36 = vadd.f32 %v1515_v34, %v5195_v38  ;;  %v1730_v38 = vsel %vm1175_vm5, %v761_v35, 0  ;;  %v4182_v34 = vcombine.high %v1851_v26, %v1859_v31  ;;  %v4702_v26 = vld [vmem:[%s5088_s2 + $0x78] sm:$0xff]  }
 0x7d6   : > { %v4625_v37 = vpop.f32.mrf.mxu0  ;;  %4641 = vmatpush3.bf16.msra.mxu1 %v1730_v38  ;;  %v4704_v31 = vld [vmem:[%s5088_s2 + $0x38] sm:$0xff]   ;;  %p4330_p8 = scmp.ne.s32.totalorder %s5641_s28, 1 }
 0x7d7   : > { %2166 = vmatprep.subr.bf16.mxu1 %v4178_v19 }
 0x83f   : > { %v1633_v39 = vpop.xlane.xlu0 %1632 }
 0x840   : > { %4858 = vrcp.f32 %v1633_v39 }
 0x843   : > { %v1630_v40 = vpop.xlane.xlu0 %1629 }
 0x844   : > { %4860 = vrcp.f32 %v1630_v40 }
 0x847   : > { %v1639_v41 = vpop.permute.xlu0 %1638 }
 0x848   : > { %4635 = vmatprep.subr.mxu0 %v1639_v41 }
 0x849   : > { %4636 = vmatpush3.msra.mxu0 %v1639_v41 }
 0x84a   : > { %2123 = vmatprep.subr.bf16.mxu0 %v4176_v15  ;;  %v1863_v15 = vld [vmem:[%s5082_s14 + $0xf8] sm:$0xff] }
 0x84b   : > { %v4190_v19 = vcombine.high %v1855_v14, %v1863_v15 }
 0x84d   : > { %v4859_v42 = vpop.eup %4858 }
 0x84e   : > { %v1637_v44 = vmul.f32 %v4859_v42, %v4855_v22  ;;  %v1858_v22 = vld [vmem:[%s5082_s14 + $0xd0] sm:$0xff] }
 0x851   : > { %v4861_v43 = vpop.eup %4860 }
 0x852   : > { %v1636_v10 = vmul.f32 %v4861_v43, %v4857_v30  ;;  %v4180_v30 = vcombine.high %v1850_v29, %v1858_v22 }
 0x854   : > { %4637 = vmatprep.mubr.msk.f32.mxu0 %vm856_vm4, %v1636_v10 }
 0x855   : > { %4638 = vmatmul.mubr.msk.f32.vlgmr.msra.gmra.mxu0 %vm856_vm4, %v1637_v44  ;;  %v4157_v44 = vld [vmem:[%s5636_s26] ss:$0 sm:$0xff] }
 0x856   : > { %2124 = vmatpush1.bf16.msra.mxu0 %v4175_v17  ;;  %2143 = vmatprep.mubr.bf16.mxu0 %v4925_v13 }
 0x857   : > { %2125 = vmatprep.subr.bf16.mxu0 %v4160_v23  ;;  %v1847_v23 = vld [vmem:[%s5082_s14 + $0x78] sm:$0xff] }
 0x85a   : > { %2126 = vmatpush1.bf16.msra.mxu0 %v4159_v25  ;;  %v4189_v25 = vcombine.low %v1855_v14, %v1863_v15 }
 0x85b   : > { %2209 = vmatprep.subr.bf16.mxu0 %v4180_v30  ;;  %v4703_v30 = vld [vmem:[%s5088_s2 + $0xf8] sm:$0xff]  }
 0x915   : > { %v4639_v45 = vpop.f32.mrf.mxu0 }
 0x917   : > { %v1716_v46 = vpop.f32.mrf.mxu0 }
 0x918   : > { %v1725_v47 = vpack.c.bf16 %v4639_v45, %v1716_v46  ;;  %v4158_v46 = vld [vmem:[%s5637_s15] ss:$0 sm:$0xff] }
 0x91a   : > { %4643 = vmatmul.mubr.msk.bf16.vlgmr.msra.gmra.mxu1 %vm768_vm3, %v1725_v47 }
 0x91b   : > { %2167 = vmatpush1.bf16.msra.mxu1 %v4177_v18  ;;  %2186 = vmatprep.mubr.bf16.mxu1 %v4925_v13  ;;  %v4188_v18 = vcombine.high %v1854_v11, %v1862_v12 }
 0x91c   : > { %2168 = vmatprep.subr.bf16.mxu1 %v4162_v28  ;;  %v4174_v28 = vcombine.high %v1839_v21, %v1847_v23 }
 0x91f   : > { %2169 = vmatpush1.bf16.msra.mxu1 %v4161_v27  ;;  %v4172_v27 = vcombine.high %v1838_v20, %v1846_v3 }
 0x920   : > { %2252 = vmatprep.subr.bf16.mxu1 %v4182_v34  ;;  %v4707_v34 = vld [vmem:[%s5088_s2 + $0xf0] sm:$0xff]  }
 0x9da   : > { %v1766_v48 = vpop.f32.mrf.mxu1 }
 0x9db   : > { %v1773_v50 = vadd.f32 %v1766_v48, %v1519_v32  ;;  %v4179_v32 = vcombine.low %v1850_v29, %v1858_v22  ;;  %v1834_v48 = vld [vmem:[%s5082_s14 + $0x10] sm:$0xff]  ;;  %v4171_v29 = vcombine.low %v1838_v20, %v1846_v3  ;;  %v4173_v22 = vcombine.low %v1839_v21, %v1847_v23 }
 0x9dc   : > { %v4644_v51 = vpop.f32.mrf.mxu1 }
 0x9dd   : > { %v1782_v52 = vadd.f32 %v4156_v49, %v1773_v50  ;;  %v1835_v50 = vld [vmem:[%s5082_s14 + $0x18] sm:$0xff] }
 0x9de   : > { %v1769_v53 = vpop.f32.mrf.mxu1  ;;  %v1843_v51 = vld [vmem:[%s5082_s14 + $0x58] sm:$0xff] }
 0x9df   : > { %v1774_v54 = vadd.f32 %v1769_v53, %v1520_v36  ;;  %v1784_v56 = vadd.f32 %v4870_v55, %v1782_v52 }
 0x9e0   : > { %v4645_v57 = vpop.f32.mrf.mxu1 }
 0x9e1   : > { %v1783_v58 = vadd.f32 %v4156_v49, %v1774_v54  ;;  %v1786_v59 = vsel %vm713_vm2, %v1784_v56, 0.0  ;;  %v1842_v49 = vld [vmem:[%s5082_s14 + $0x50] sm:$0xff]  ;;  %v1852_v57 = vld [vmem:[%s5082_s14 + $0xa0] sm:$0xff] }
 0x9e2   : > { %1787 = vadd.xlane.f32.xlu1 %v1786_v59  ;;  %v4164_v55 = vcombine.high %v1834_v48, %v1842_v49  ;;  %v1853_v59 = vld [vmem:[%s5082_s14 + $0xa8] sm:$0xff] }
 0x9e3   : > { %v1785_v61 = vadd.f32 %v4871_v60, %v1783_v58  ;;  %v1860_v58 = vld [vmem:[%s5082_s14 + $0xe0] sm:$0xff]  ;;  %v1861_v60 = vld [vmem:[%s5082_s14 + $0xe8] sm:$0xff] }
 0x9e5   : > { %v1789_v62 = vsel %vm713_vm2, %v1785_v61, 0.0 }
 0x9e6   : > { %1790 = vadd.xlane.f32.xlu0 %v1789_v62  ;;  %v4165_v62 = vcombine.low %v1835_v50, %v1843_v51 }
 0xa6b   : > { %v1788_v63 = vpop.xlane.xlu1 %1787 }
 0xa6c   : > { %v1793_v0 = vmul.f32 0.03125, %v1788_v63  ;;  %v4184_v63 = vcombine.high %v1852_v57, %v1860_v58 }
 0xa6e   : > { %v1795_v1 = vsub.f32 %v1784_v56, %v1793_v0  ;;  %v4166_v56 = vcombine.high %v1835_v50, %v1843_v51  ;;  %v4186_v0 = vcombine.high %v1853_v59, %v1861_v60  ;;  %v4725_v50 = vld [vmem:[%s5088_s2 + $0x90] sm:$0xff]   ;;  %v4726_v51 = vld [vmem:[%s5088_s2 + $0x48] sm:$0xff]  }
 0xa6f   : > { %v1791_v2 = vpop.xlane.xlu0 %1790 }
 0xa70   : > { %v1794_v4 = vmul.f32 0.03125, %v1791_v2  ;;  %v1797_v5 = vmul.f32 %v1795_v1, %v1795_v1  ;;  %v1844_v2 = vld [vmem:[%s5082_s14 + $0x60] sm:$0xff] }
 0xa72   : > { %v1796_v6 = vsub.f32 %v1785_v61, %v1794_v4  ;;  %v1799_v7 = vsel %vm713_vm2, %v1797_v5, 0.0  ;;  %v4163_v61 = vcombine.low %v1834_v48, %v1842_v49  ;;  %v1837_v4 = vld [vmem:[%s5082_s14 + $0x28] sm:$0xff]  ;;  %v4723_v48 = vld [vmem:[%s5088_s2 + $0xd0] sm:$0xff]  }
 0xa73   : > { %1800 = vadd.xlane.f32.xlu1 %v1799_v7  ;;  %v1845_v5 = vld [vmem:[%s5082_s14 + $0x68] sm:$0xff]  ;;  %v4185_v7 = vcombine.low %v1853_v59, %v1861_v60  ;;  %v4724_v49 = vld [vmem:[%s5088_s2 + $0x10] sm:$0xff]   ;;  %v4732_v59 = vld [vmem:[%s5088_s2] sm:$0xff]  }
 0xa74   : > { %v1798_v8 = vmul.f32 %v1796_v6, %v1796_v6  ;;  %v4169_v17 = vcombine.low %v1837_v4, %v1845_v5  ;;  %v4733_v60 = vld [vmem:[%s5088_s2 + $0x80] sm:$0xff]  }
 0xa76   : > { %v1802_v9 = vsel %vm713_vm2, %v1798_v8, 0.0 }
 0xa77   : > { %1803 = vadd.xlane.f32.xlu0 %v1802_v9  ;;  %v4170_v9 = vcombine.high %v1837_v4, %v1845_v5 }
 0xafc   : > { %v1801_v36 = vpop.xlane.xlu1 %1800 }
 0xafd   : > { %v1805_v37 = vmul.f32 0.03125, %v1801_v36  ;;  %v4709_v36 = vld [vmem:[%s5088_s2 + $0xb0] sm:$0xff]  }
 0xaff   : > { %v1807_v39 = vadd.f32 1e-05, %v1805_v37  ;;  %v4710_v37 = vld [vmem:[%s5088_s2 + $0x68] sm:$0xff]  }
 0xb00   : > { %v1804_v40 = vpop.xlane.xlu0 %1803 }
 0xb01   : > { %4862 = vrsqrt.f32 %v1807_v39  ;;  %v1806_v41 = vmul.f32 0.03125, %v1804_v40  ;;  %v4711_v39 = vld [vmem:[%s5088_s2 + $0xe8] sm:$0xff]  }
 0xb02   : > { %v4712_v40 = vld [vmem:[%s5088_s2 + $0x28] sm:$0xff]  }
 0xb03   : > { %v1808_v42 = vadd.f32 1e-05, %v1806_v41  ;;  %v4713_v41 = vld [vmem:[%s5088_s2 + $0xa8] sm:$0xff]  }
 0xb05   : > { %4864 = vrsqrt.f32 %v1808_v42  ;;  %v4714_v42 = vld [vmem:[%s5088_s2 + $0x60] sm:$0xff]  }
 0xb0e   : > { %v4863_v43 = vpop.eup %4862 }
 0xb0f   : > { %v1811_v10 = vmul.f32 %v4863_v43, %v1795_v1  ;;  %v1836_v1 = vld [vmem:[%s5082_s14 + $0x20] sm:$0xff] }
 0xb10   : > { %v4168_v8 = vcombine.high %v1836_v1, %v1844_v2  ;;  %v4167_v16 = vcombine.low %v1836_v1, %v1844_v2  ;;  %v4715_v43 = vld [vmem:[%s5088_s2 + $0xe0] sm:$0xff]  }
 0xb11   : > { %v1820_v38 = vmul.f32 %v4157_v44, %v1811_v10  ;;  %v4716_v10 = vld [vmem:[%s5088_s2 + $0x20] sm:$0xff]  }
 0xb12   : > { %v4865_v35 = vpop.eup %4864 }
 0xb13   : > { %v1812_v45 = vmul.f32 %v4865_v35, %v1796_v6  ;;  %v5275_v52 = vadd.f32 %v4158_v46, %v1820_v38  ;;  %v4183_v6 = vcombine.low %v1852_v57, %v1860_v58  ;;  %v4718_v35 = vld [vmem:[%s5088_s2 + $0x58] sm:$0xff]   ;;  %v4730_v57 = vld [vmem:[%s5088_s2 + $0x40] sm:$0xff]  }
 0xb14   : > { %v4719_v38 = vld [vmem:[%s5088_s2 + $0xd8] sm:$0xff]   ;;  %v4731_v58 = vld [vmem:[%s5088_s2 + $0xc0] sm:$0xff]  }
 0xb15   : > { %v1821_v47 = vmul.f32 %v4157_v44, %v1812_v45  ;;  %v4717_v44 = vld [vmem:[%s5088_s2 + $0xa0] sm:$0xff]   ;;  %v4720_v45 = vld [vmem:[%s5088_s2 + $0x18] sm:$0xff]  }
 0xb17   : > { %v5277_v53 = vadd.f32 %v4158_v46, %v1821_v47  ;;  %v4721_v46 = vld [vmem:[%s5088_s2 + $0x98] sm:$0xff]   ;;  %v4722_v47 = vld [vmem:[%s5088_s2 + $0x50] sm:$0xff]  }
 0xb19   : > { %v5281_v54 = vpack.c.bf16 %v5277_v53, %v5275_v52 }
 0xb1b   : > { %4191 = vmatmul.mubr.msk.bf16.vlgmr.msra.gmra.mxu0 %vm713_vm2, %v5281_v54  ;;  %4192 = vmatmul.mubr.msk.bf16.vlgmr.msra.gmra.mxu1 %vm713_vm2, %v5281_v54 }
 0xb1c   : > { %2210 = vmatpush1.bf16.msra.mxu0 %v4179_v32  ;;  %2253 = vmatpush1.bf16.msra.mxu1 %v4181_v33  ;;  %v4705_v32 = vld [vmem:[%s5088_s2 + $0xb8] sm:$0xff]   ;;  %v4706_v33 = vld [vmem:[%s5088_s2 + $0x70] sm:$0xff]  }
 0xb1d   : > { %2211 = vmatprep.subr.bf16.mxu0 %v4164_v55  ;;  %2254 = vmatprep.subr.bf16.mxu1 %v4166_v56  ;;  %v4728_v55 = vld [vmem:[%s5088_s2 + $0x8] sm:$0xff]  }
 0xb1e   : > { %2229 = vmatprep.mubr.bf16.mxu0 %v4925_v13  ;;  %2272 = vmatprep.mubr.bf16.mxu1 %v4925_v13  ;;  %v4729_v56 = vld [vmem:[%s5088_s2 + $0x88] sm:$0xff]  }
 0xb20   : > { %2212 = vmatpush1.bf16.msra.mxu0 %v4163_v61  ;;  %2255 = vmatpush1.bf16.msra.mxu1 %v4165_v62  ;;  %v4734_v61 = vld [vmem:[%s5088_s2 + $0x178] sm:$0xff]  }
 0xb21   : > { %2295 = vmatprep.subr.bf16.mxu0 %v4184_v63  ;;  %2338 = vmatprep.subr.bf16.mxu1 %v4186_v0  ;;  %v4735_v62 = vld [vmem:[%s5088_s2 + $0x1f8] sm:$0xff]   ;;  %v1868_v63 = vlaneseq }
 0xb23   : > { %4193 = vmatmul.mubr.msk.bf16.vlgmr.msra.gmra.mxu0 %vm713_vm2, %v5281_v54  ;;  %4194 = vmatmul.mubr.msk.bf16.vlgmr.msra.gmra.mxu1 %vm713_vm2, %v5281_v54  ;;  %v5355_v0 = vshrl.u32 %v1868_v63, 7 }
 0xb24   : > { %2296 = vmatpush1.bf16.msra.mxu0 %v4183_v6  ;;  %2339 = vmatpush1.bf16.msra.mxu1 %v4185_v7  ;;  %v5362_v6 = vld [vmem:[%s5077_s30] sm:$0xff] }
 0xb25   : > { %2297 = vmatprep.subr.bf16.mxu0 %v4168_v8  ;;  %2340 = vmatprep.subr.bf16.mxu1 %v4170_v9  ;;  %v1874_v1 = vsub.s32 1, %v5355_v0  ;;  %v1882_v2 = vsub.s32 3, %v5355_v0  ;;  %v1870_v4 = vsub.s32 0, %v5355_v0  ;;  %v1878_v5 = vsub.s32 2, %v5355_v0 }
 0xb26   : > { %2315 = vmatprep.mubr.bf16.mxu0 %v4925_v13  ;;  %2358 = vmatprep.mubr.bf16.mxu1 %v4925_v13  ;;  %v1898_v20 = vsub.s32 7, %v5355_v0 }
 0xb27   : > { %v1875_v9 = vrot.slane %v5362_v6, %v1874_v1  ;;  %v1883_v11 = vrot.slane %v5362_v6, %v1882_v2  ;;  %v1871_v12 = vrot.slane %v5362_v6, %v1870_v4  ;;  %v1879_v14 = vrot.slane %v5362_v6, %v1878_v5 }
 0xb28   : > { %2298 = vmatpush1.bf16.msra.mxu0 %v4167_v16  ;;  %2341 = vmatpush1.bf16.msra.mxu1 %v4169_v17 }
 0xb29   : > { %2381 = vmatprep.subr.bf16.mxu0 %v4188_v18  ;;  %2424 = vmatprep.subr.bf16.mxu1 %v4190_v19  ;;  %v1890_v19 = vsub.s32 5, %v5355_v0 }
 0xb2b   : > { %4195 = vmatmul.mubr.msk.bf16.vlgmr.msra.gmra.mxu0 %vm713_vm2, %v5281_v54  ;;  %4196 = vmatmul.mubr.msk.bf16.vlgmr.msra.gmra.mxu1 %vm713_vm2, %v5281_v54 }
 0xb2c   : > { %2382 = vmatpush1.bf16.msra.mxu0 %v4187_v24  ;;  %2425 = vmatpush1.bf16.msra.mxu1 %v4189_v25 }
 0xb2d   : > { %2383 = vmatprep.subr.bf16.mxu0 %v4172_v27  ;;  %2426 = vmatprep.subr.bf16.mxu1 %v4174_v28 }
 0xb2e   : > { %2401 = vmatprep.mubr.bf16.mxu0 %v4925_v13  ;;  %2444 = vmatprep.mubr.bf16.mxu1 %v4925_v13  ;;  %v4708_v13 = vld [vmem:[%s5088_s2 + $0x30] sm:$0xff]  }
 0xb30   : > { %2384 = vmatpush1.bf16.msra.mxu0 %v4171_v29  ;;  %2427 = vmatpush1.bf16.msra.mxu1 %v4173_v22 }
 0xb31   : > { %4382 = vmatprep.subr.bf16.mxu0 %v4702_v26  ;;  %4404 = vmatprep.subr.bf16.mxu1 %v4703_v30 }
 0xb33   : > { %4197 = vmatmul.mubr.msk.bf16.vlgmr.msra.gmra.mxu0 %vm713_vm2, %v5281_v54  ;;  %4198 = vmatmul.mubr.msk.bf16.vlgmr.msra.gmra.mxu1 %vm713_vm2, %v5281_v54  ;;  %v4727_v54 = vld [vmem:[%s5088_s2 + $0xc8] sm:$0xff]  }
 0xb34   : > { %4383 = vmatpush3.bf16.msra.mxu0 %v4704_v31  ;;  %4405 = vmatpush3.bf16.msra.mxu1 %v4705_v32 }
 0xb35   : > { %4384 = vmatprep.subr.bf16.mxu0 %v4706_v33  ;;  %4406 = vmatprep.subr.bf16.mxu1 %v4707_v34  ;;  %v1891_v34 = vrot.slane %v5362_v6, %v1890_v19 }
 0xb38   : > { %4385 = vmatpush3.bf16.msra.mxu0 %v4708_v13  ;;  %4407 = vmatpush3.bf16.msra.mxu1 %v4709_v36  ;;  %v1899_v13 = vrot.slane %v5362_v6, %v1898_v20 }
 0xb39   : > { %4386 = vmatprep.subr.bf16.mxu0 %v4710_v37  ;;  %4408 = vmatprep.subr.bf16.mxu1 %v4711_v39 }
 0xb3c   : > { %4387 = vmatpush3.bf16.msra.mxu0 %v4712_v40  ;;  %4409 = vmatpush3.bf16.msra.mxu1 %v4713_v41 }
 0xb3d   : > { %4388 = vmatprep.subr.bf16.mxu0 %v4714_v42  ;;  %4410 = vmatprep.subr.bf16.mxu1 %v4715_v43 }
 0xb40   : > { %4389 = vmatpush3.bf16.msra.mxu0 %v4716_v10  ;;  %4411 = vmatpush3.bf16.msra.mxu1 %v4717_v44 }
 0xb41   : > { %4390 = vmatprep.subr.bf16.mxu0 %v4718_v35  ;;  %4412 = vmatprep.subr.bf16.mxu1 %v4719_v38  ;;  %v4736_v38 = vld [vmem:[%s5088_s2 + $0x138] sm:$0xff]  }
 0xb44   : > { %4391 = vmatpush3.bf16.msra.mxu0 %v4720_v45  ;;  %4413 = vmatpush3.bf16.msra.mxu1 %v4721_v46  ;;  %v4737_v45 = vld [vmem:[%s5088_s2 + $0x1b8] sm:$0xff]  }
 0xb45   : > { %4392 = vmatprep.subr.bf16.mxu0 %v4722_v47  ;;  %4414 = vmatprep.subr.bf16.mxu1 %v4723_v48 }
 0xb48   : > { %4393 = vmatpush3.bf16.msra.mxu0 %v4724_v49  ;;  %4415 = vmatpush3.bf16.msra.mxu1 %v4725_v50  ;;  %v4738_v50 = vld [vmem:[%s5088_s2 + $0x170] sm:$0xff]  }
 0xb49   : > { %4394 = vmatprep.subr.bf16.mxu0 %v4726_v51  ;;  %4416 = vmatprep.subr.bf16.mxu1 %v4727_v54  ;;  %v4739_v51 = vld [vmem:[%s5088_s2 + $0x1f0] sm:$0xff]  }
 0xb4c   : > { %4395 = vmatpush3.bf16.msra.mxu0 %v4728_v55  ;;  %4417 = vmatpush3.bf16.msra.mxu1 %v4729_v56 }
 0xb4d   : > { %4396 = vmatprep.subr.bf16.mxu0 %v4730_v57  ;;  %4418 = vmatprep.subr.bf16.mxu1 %v4731_v58 }
 0xb50   : > { %4397 = vmatpush3.bf16.msra.mxu0 %v4732_v59  ;;  %4419 = vmatpush3.bf16.msra.mxu1 %v4733_v60  ;;  %v4740_v60 = vld [vmem:[%s5088_s2 + $0x130] sm:$0xff]  }
 0xb51   : > { %4426 = vmatprep.subr.bf16.mxu0 %v4734_v61  ;;  %4448 = vmatprep.subr.bf16.mxu1 %v4735_v62  ;;  %v4741_v61 = vld [vmem:[%s5088_s2 + $0x1b0] sm:$0xff]   ;;  %v4742_v62 = vld [vmem:[%s5088_s2 + $0x168] sm:$0xff]  }
 0xbdb   : > { %v2145_v7 = vpop.f32.mrf.mxu0  ;;  %v2188_v8 = vpop.f32.mrf.mxu1 }
 0xbdc   : > { %v2146_v25 = vadd.f32 %v2145_v7, %v1871_v12  ;;  %v2189_v27 = vadd.f32 %v2188_v8, %v1879_v14 }
 0xbdd   : > { %v2147_v15 = vpop.f32.mrf.mxu0  ;;  %v2190_v16 = vpop.f32.mrf.mxu1 }
 0xbde   : > { %v2148_v3 = vadd.f32 %v2147_v15, %v1875_v9  ;;  %v2191_v21 = vadd.f32 %v2190_v16, %v1883_v11  ;;  %v2455_v41 = vmax.f32 %v2146_v25, 0.0  ;;  %v2457_v42 = vmax.f32 %v2189_v27, 0.0  ;;  %v4744_v15 = vld [vmem:[%s5088_s2 + $0x128] sm:$0xff]   ;;  %v4750_v25 = vld [vmem:[%s5088_s2 + $0x158] sm:$0xff]  }
 0xbdf   : > { %v2149_v17 = vpop.f32.mrf.mxu0  ;;  %v2192_v18 = vpop.f32.mrf.mxu1  ;;  %v4745_v16 = vld [vmem:[%s5088_s2 + $0x1a8] sm:$0xff]   ;;  %v4751_v27 = vld [vmem:[%s5088_s2 + $0x1d8] sm:$0xff]  }
 0xbe0   : > { %v2150_v23 = vadd.f32 %v2149_v17, %v1871_v12  ;;  %v2193_v24 = vadd.f32 %v2192_v18, %v1879_v14  ;;  %v2456_v36 = vmax.f32 %v2148_v3, 0.0  ;;  %v2458_v37 = vmax.f32 %v2191_v21, 0.0  ;;  %v4746_v17 = vld [vmem:[%s5088_s2 + $0x160] sm:$0xff]  }
 0xbe1   : > { %v2151_v28 = vpop.f32.mrf.mxu0  ;;  %v2194_v29 = vpop.f32.mrf.mxu1  ;;  %v4747_v18 = vld [vmem:[%s5088_s2 + $0x1e0] sm:$0xff]  }
 0xbe2   : > { %v2152_v22 = vadd.f32 %v2151_v28, %v1875_v9  ;;  %v2195_v26 = vadd.f32 %v2194_v29, %v1883_v11  ;;  %v2471_v30 = vmax.f32 %v2150_v23, 0.0  ;;  %v2473_v31 = vmax.f32 %v2193_v24, 0.0  ;;  %v4743_v11 = vld [vmem:[%s5088_s2 + $0x1e8] sm:$0xff]   ;;  %v4748_v21 = vld [vmem:[%s5088_s2 + $0x120] sm:$0xff]   ;;  %v4752_v29 = vld [vmem:[%s5088_s2 + $0x118] sm:$0xff]  }
 0xbe3   : > { %v5378_v32 = vpop.f32.mrf.mxu0  ;;  %v5380_v33 = vpop.f32.mrf.mxu1  ;;  %v4749_v24 = vld [vmem:[%s5088_s2 + $0x1a0] sm:$0xff]  }
 0xbe4   : > { %v2472_v39 = vmax.f32 %v2152_v22, 0.0  ;;  %v2474_v40 = vmax.f32 %v2195_v26, 0.0  ;;  %v2487_v46 = vpack.c.bf16 %v2471_v30, %v2455_v41  ;;  %v2489_v47 = vpack.c.bf16 %v2473_v31, %v2457_v42  ;;  %v4753_v26 = vld [vmem:[%s5088_s2 + $0x198] sm:$0xff]   ;;  %v4754_v30 = vld [vmem:[%s5088_s2 + $0x150] sm:$0xff]   ;;  %v4758_v41 = vld [vmem:[%s5088_s2 + $0x148] sm:$0xff]  }
 0xbe5   : > { %v2233_v43 = vpop.f32.mrf.mxu0  ;;  %v2276_v10 = vpop.f32.mrf.mxu1  ;;  %v4755_v31 = vld [vmem:[%s5088_s2 + $0x1d0] sm:$0xff]   ;;  %v4759_v42 = vld [vmem:[%s5088_s2 + $0x1c8] sm:$0xff]  }
 0xbe6   : > { %v2488_v44 = vpack.c.bf16 %v2472_v39, %v2456_v36  ;;  %v2490_v35 = vpack.c.bf16 %v2474_v40, %v2458_v37  ;;  %v2234_v54 = vadd.f32 %v2233_v43, %v1891_v34  ;;  %v2277_v55 = vadd.f32 %v2276_v10, %v1899_v13  ;;  %v4756_v37 = vld [vmem:[%s5088_s2 + $0x110] sm:$0xff]  }
 0xbe7   : > { %v5390_v48 = vpop.f32.mrf.mxu0  ;;  %v5392_v49 = vpop.f32.mrf.mxu1  ;;  %v4757_v40 = vld [vmem:[%s5088_s2 + $0x190] sm:$0xff]  }
 0xbe8   : > { %3566 = vmatprep.mubr.bf16.mxu0 %v2488_v44  ;;  %3607 = vmatprep.mubr.bf16.mxu1 %v2490_v35  ;;  %v2460_v63 = vmax.f32 %v2234_v54, 0.0  ;;  %v2462_v7 = vmax.f32 %v2277_v55, 0.0  ;;  %v5433_v44 = vld [vmem:[%s5077_s30 + $0x8] sm:$0xff] }
 0xbe9   : > { %v2237_v56 = vpop.f32.mrf.mxu0  ;;  %v2280_v57 = vpop.f32.mrf.mxu1  ;;  %3567 = vmatmul.mubr.bf16.vlgmr.msra.gmra.mxu0 %v2487_v46  ;;  %3608 = vmatmul.mubr.bf16.vlgmr.msra.gmra.mxu1 %v2489_v47  ;;  %v1907_v46 = vrot.slane %v5433_v44, %v1874_v1  ;;  %v1915_v54 = vrot.slane %v5433_v44, %v1882_v2 }
 0xbea   : > { %v2238_v58 = vadd.f32 %v2237_v56, %v1891_v34  ;;  %v2281_v59 = vadd.f32 %v2280_v57, %v1899_v13  ;;  %4427 = vmatpush3.bf16.msra.mxu0 %v4736_v38  ;;  %4449 = vmatpush3.bf16.msra.mxu1 %v4737_v45  ;;  %v1886_v34 = vsub.s32 4, %v5355_v0  ;;  %v1894_v13 = vsub.s32 6, %v5355_v0  ;;  %v4760_v38 = vld [vmem:[%s5088_s2 + $0x108] sm:$0xff]   ;;  %v4828_v0 = vld [vmem:[%s5088_s2 + $0x300] sm:$0xff]  }
 0xbeb   : > { %4428 = vmatprep.subr.bf16.mxu0 %v4738_v50  ;;  %4450 = vmatprep.subr.bf16.mxu1 %v4739_v51  ;;  %v5404_v3 = vpop.f32.mrf.mxu0  ;;  %v5407_v23 = vpop.f32.mrf.mxu1  ;;  %v4761_v50 = vld [vmem:[%s5088_s2 + $0x188] sm:$0xff]   ;;  %v4762_v51 = vld [vmem:[%s5088_s2 + $0x140] sm:$0xff]  }
 0xbec   : > { %v2476_v8 = vmax.f32 %v2238_v58, 0.0  ;;  %v2478_v9 = vmax.f32 %v2281_v59, 0.0  ;;  %v1887_v43 = vrot.slane %v5362_v6, %v1886_v34  ;;  %v1895_v10 = vrot.slane %v5362_v6, %v1894_v13  ;;  %v4764_v58 = vld [vmem:[%s5088_s2 + $0x100] sm:$0xff]  }
 0xbed   : > { %v2319_v28 = vpop.f32.mrf.mxu0  ;;  %v2362_v22 = vpop.f32.mrf.mxu1 }
 0xbee   : > { %v2492_v12 = vpack.c.bf16 %v2476_v8, %v2460_v63  ;;  %v2494_v14 = vpack.c.bf16 %v2478_v9, %v2462_v7  ;;  %4429 = vmatpush3.bf16.msra.mxu0 %v4740_v60  ;;  %4451 = vmatpush3.bf16.msra.mxu1 %v4741_v61  ;;  %v2236_v45 = vadd.f32 %v5390_v48, %v1887_v43  ;;  %v4763_v48 = vld [vmem:[%s5088_s2 + $0x1c0] sm:$0xff]   ;;  %v4766_v61 = vld [vmem:[%s5088_s2 + $0x278] sm:$0xff]  }
 0xbef   : > { %4430 = vmatprep.subr.bf16.mxu0 %v4742_v62  ;;  %4452 = vmatprep.subr.bf16.mxu1 %v4743_v11  ;;  %v5418_v36 = vpop.f32.mrf.mxu0  ;;  %v5421_v39 = vpop.f32.mrf.mxu1  ;;  %v2279_v6 = vadd.f32 %v5392_v49, %v1895_v10  ;;  %v2232_v55 = vadd.f32 %v5378_v32, %v1887_v43  ;;  %v2275_v1 = vadd.f32 %v5380_v33, %v1895_v10  ;;  %v4765_v49 = vld [vmem:[%s5088_s2 + $0x180] sm:$0xff]   ;;  %v4767_v63 = vld [vmem:[%s5088_s2 + $0x2f8] sm:$0xff]  }
 0xbf0   : > { %3648 = vmatprep.mubr.bf16.mxu0 %v2492_v12  ;;  %3689 = vmatprep.mubr.bf16.mxu1 %v2494_v14  ;;  %v2475_v59 = vmax.f32 %v2236_v45, 0.0  ;;  %v2320_v60 = vadd.f32 %v2319_v28, %v1907_v46  ;;  %v2363_v62 = vadd.f32 %v2362_v22, %v1915_v54  ;;  %v4768_v9 = vld [vmem:[%s5088_s2 + $0x238] sm:$0xff]   ;;  %v4774_v28 = vld [vmem:[%s5088_s2 + $0x268] sm:$0xff]  }
 0xbf1   : > { %v2323_v35 = vpop.f32.mrf.mxu0  ;;  %v2366_v47 = vpop.f32.mrf.mxu1  ;;  %v2477_v2 = vmax.f32 %v2279_v6, 0.0  ;;  %v2459_v32 = vmax.f32 %v2232_v55, 0.0  ;;  %v2461_v33 = vmax.f32 %v2275_v1, 0.0  ;;  %v4769_v14 = vld [vmem:[%s5088_s2 + $0x2b8] sm:$0xff]   ;;  %v4776_v22 = vld [vmem:[%s5088_s2 + $0x228] sm:$0xff]   ;;  %v4788_v6 = vld [vmem:[%s5088_s2 + $0x210] sm:$0xff]   ;;  %v1903_v1 = vrot.slane %v5433_v44, %v1870_v4 }
 0xbf2   : > { %4431 = vmatpush3.bf16.msra.mxu0 %v4744_v15  ;;  %4453 = vmatpush3.bf16.msra.mxu1 %v4745_v16  ;;  %v2324_v56 = vadd.f32 %v2323_v35, %v1907_v46  ;;  %v2367_v57 = vadd.f32 %v2366_v47, %v1915_v54  ;;  %v2464_v12 = vmax.f32 %v2320_v60, 0.0  ;;  %v2466_v16 = vmax.f32 %v2363_v62, 0.0  ;;  %v4782_v43 = vld [vmem:[%s5088_s2 + $0x258] sm:$0xff]   ;;  %v4786_v47 = vld [vmem:[%s5088_s2 + $0x250] sm:$0xff]   ;;  %v4790_v55 = vld [vmem:[%s5088_s2 + $0x248] sm:$0xff]  }
 0xbf3   : > { %4432 = vmatprep.subr.bf16.mxu0 %v4746_v17  ;;  %4454 = vmatprep.subr.bf16.mxu1 %v4747_v18  ;;  %v2491_v11 = vpack.c.bf16 %v2475_v59, %v2459_v32  ;;  %v2493_v15 = vpack.c.bf16 %v2477_v2, %v2461_v33  ;;  %v4770_v17 = vld [vmem:[%s5088_s2 + $0x270] sm:$0xff]   ;;  %v4783_v10 = vld [vmem:[%s5088_s2 + $0x2d8] sm:$0xff]   ;;  %v4792_v59 = vld [vmem:[%s5088_s2 + $0x208] sm:$0xff]   ;;  %v2322_v60 = vadd.f32 %v5418_v36, %v1903_v1 }
 0xbf4   : > { %v2480_v7 = vmax.f32 %v2324_v56, 0.0  ;;  %v2482_v8 = vmax.f32 %v2367_v57, 0.0  ;;  %v4785_v46 = vld [vmem:[%s5088_s2 + $0x298] sm:$0xff]   ;;  %v4791_v56 = vld [vmem:[%s5088_s2 + $0x2c8] sm:$0xff]   ;;  %v1911_v57 = vrot.slane %v5433_v44, %v1878_v5  ;;  %v4794_v4 = vld [vmem:[%s5088_s2 + $0x240] sm:$0xff]   ;;  %v1931_v5 = vrot.slane %v5433_v44, %v1898_v20 }
 0xbf5   : > { %v4793_v2 = vld [vmem:[%s5088_s2 + $0x288] sm:$0xff]   ;;  %v4795_v36 = vld [vmem:[%s5088_s2 + $0x2c0] sm:$0xff]  }
 0xbf6   : > { %4433 = vmatpush3.bf16.msra.mxu0 %v4748_v21  ;;  %4455 = vmatpush3.bf16.msra.mxu1 %v4749_v24  ;;  %v2496_v18 = vpack.c.bf16 %v2480_v7, %v2464_v12  ;;  %v4771_v21 = vld [vmem:[%s5088_s2 + $0x2f0] sm:$0xff]   ;;  %v2498_v24 = vpack.c.bf16 %v2482_v8, %v2466_v16  ;;  %v2365_v62 = vadd.f32 %v5421_v39, %v1911_v57  ;;  %v4796_v33 = vld [vmem:[%s5088_s2 + $0x200] sm:$0xff]   ;;  %v2479_v8 = vmax.f32 %v2322_v60, 0.0 }
 0xbf7   : > { %4434 = vmatprep.subr.bf16.mxu0 %v4750_v25  ;;  %4456 = vmatprep.subr.bf16.mxu1 %v4751_v27  ;;  %v4772_v25 = vld [vmem:[%s5088_s2 + $0x230] sm:$0xff]   ;;  %v4797_v39 = vld [vmem:[%s5088_s2 + $0x280] sm:$0xff]   ;;  %v1919_v60 = vrot.slane %v5433_v44, %v1886_v34 }
 0xbf8   : > { %v4773_v27 = vld [vmem:[%s5088_s2 + $0x2b0] sm:$0xff]   ;;  %v2481_v20 = vmax.f32 %v2365_v62, 0.0  ;;  %v4826_v62 = vld [vmem:[%s5088_s2 + $0x340] sm:$0xff]  }
 0xbfa   : > { %4435 = vmatpush3.bf16.msra.mxu0 %v4752_v29  ;;  %4457 = vmatpush3.bf16.msra.mxu1 %v4753_v26  ;;  %v4775_v29 = vld [vmem:[%s5088_s2 + $0x2e8] sm:$0xff]  }
 0xbfb   : > { %4436 = vmatprep.subr.bf16.mxu0 %v4754_v30  ;;  %4458 = vmatprep.subr.bf16.mxu1 %v4755_v31  ;;  %v4777_v26 = vld [vmem:[%s5088_s2 + $0x2a8] sm:$0xff]   ;;  %v4778_v30 = vld [vmem:[%s5088_s2 + $0x260] sm:$0xff]  }
 0xbfc   : > { %v4779_v31 = vld [vmem:[%s5088_s2 + $0x2e0] sm:$0xff]  }
 0xbfe   : > { %4437 = vmatpush3.bf16.msra.mxu0 %v4756_v37  ;;  %4459 = vmatpush3.bf16.msra.mxu1 %v4757_v40  ;;  %v5465_v37 = vpop.f32.mrf.mxu0  ;;  %v4780_v40 = vld [vmem:[%s5088_s2 + $0x220] sm:$0xff]  }
 0xbff   : > { %4438 = vmatprep.subr.bf16.mxu0 %v4758_v41  ;;  %4460 = vmatprep.subr.bf16.mxu1 %v4759_v42  ;;  %v5468_v41 = vpop.f32.mrf.mxu1  ;;  %v4781_v42 = vld [vmem:[%s5088_s2 + $0x2a0] sm:$0xff]  }
 0xc00   : > { %v2405_v35 = vpop.f32.mrf.mxu0 }
 0xc01   : > { %v2448_v45 = vpop.f32.mrf.mxu1 }
 0xc02   : > { %4439 = vmatpush3.bf16.msra.mxu0 %v4760_v38  ;;  %4461 = vmatpush3.bf16.msra.mxu1 %v4761_v50  ;;  %v4784_v38 = vld [vmem:[%s5088_s2 + $0x218] sm:$0xff]   ;;  %v4787_v50 = vld [vmem:[%s5088_s2 + $0x2d0] sm:$0xff]   ;;  %v2449_v12 = vadd.f32 %v2448_v45, %v1931_v5  ;;  %v4812_v45 = vld [vmem:[%s5088_s2 + $0x320] sm:$0xff]  }
 0xc03   : > { %4440 = vmatprep.subr.bf16.mxu0 %v4762_v51  ;;  %4462 = vmatprep.subr.bf16.mxu1 %v4763_v48  ;;  %v5477_v51 = vpop.f32.mrf.mxu0  ;;  %v5480_v54 = vpop.f32.mrf.mxu1  ;;  %v4789_v48 = vld [vmem:[%s5088_s2 + $0x290] sm:$0xff]  }
 0xc06   : > { %4441 = vmatpush3.bf16.msra.mxu0 %v4764_v58  ;;  %4463 = vmatpush3.bf16.msra.mxu1 %v4765_v49  ;;  %v2409_v58 = vpop.f32.mrf.mxu0  ;;  %v1923_v49 = vrot.slane %v5433_v44, %v1890_v19  ;;  %v2361_v19 = vadd.f32 %v5407_v23, %v1911_v57  ;;  %v4821_v57 = vld [vmem:[%s5088_s2 + $0x390] sm:$0xff]  }
 0xc07   : > { %4470 = vmatprep.subr.bf16.mxu0 %v4766_v61  ;;  %4492 = vmatprep.subr.bf16.mxu1 %v4767_v63  ;;  %v2452_v61 = vpop.f32.mrf.mxu1  ;;  %v2318_v63 = vadd.f32 %v5404_v3, %v1903_v1  ;;  %v4820_v1 = vld [vmem:[%s5088_s2 + $0x310] sm:$0xff]  }
 0xc08   : > { %v2410_v32 = vadd.f32 %v2409_v58, %v1923_v49  ;;  %v2453_v7 = vadd.f32 %v2452_v61, %v1931_v5  ;;  %v2465_v23 = vmax.f32 %v2361_v19, 0.0  ;;  %v4822_v58 = vld [vmem:[%s5088_s2 + $0x348] sm:$0xff]  }
 0xc09   : > { %3649 = vmatmul.mubr.bf16.vlgmr.msra.gmra.mxu0 %v2491_v11  ;;  %3690 = vmatmul.mubr.bf16.vlgmr.msra.gmra.mxu1 %v2493_v15  ;;  %v4798_v11 = vld [vmem:[%s5088_s2 + $0x378] sm:$0xff]   ;;  %v2463_v3 = vmax.f32 %v2318_v63, 0.0  ;;  %v4824_v61 = vld [vmem:[%s5088_s2 + $0x308] sm:$0xff]   ;;  %v2404_v63 = vadd.f32 %v5465_v37, %v1919_v60 }
 0xc0a   : > { %4471 = vmatpush3.bf16.msra.mxu0 %v4768_v9  ;;  %3730 = vmatprep.mubr.bf16.mxu0 %v2496_v18  ;;  %v2406_v9 = vadd.f32 %v2405_v35, %v1923_v49  ;;  %v2484_v15 = vmax.f32 %v2410_v32, 0.0  ;;  %v2486_v16 = vmax.f32 %v2453_v7, 0.0  ;;  %v4810_v35 = vld [vmem:[%s5088_s2 + $0x360] sm:$0xff]   ;;  %v1927_v49 = vrot.slane %v5433_v44, %v1894_v13 }
 0xc0b   : > { %4493 = vmatpush3.bf16.msra.mxu1 %v4769_v14  ;;  %3771 = vmatprep.mubr.bf16.mxu1 %v2498_v24  ;;  %v4799_v14 = vld [vmem:[%s5088_s2 + $0x3f8] sm:$0xff]   ;;  %v2495_v18 = vpack.c.bf16 %v2479_v8, %v2463_v3  ;;  %v4829_v44 = vld [vmem:[%s5088_s2 + $0x380] sm:$0xff]  }
 0xc0c   : > { %4472 = vmatprep.subr.bf16.mxu0 %v4770_v17  ;;  %4494 = vmatprep.subr.bf16.mxu1 %v4771_v21  ;;  %v4800_v17 = vld [vmem:[%s5088_s2 + $0x338] sm:$0xff]   ;;  %v2468_v21 = vmax.f32 %v2406_v9, 0.0  ;;  %v2451_v5 = vadd.f32 %v5480_v54, %v1927_v49  ;;  %v2447_v34 = vadd.f32 %v5468_v41, %v1927_v49 }
 0xc0d   : > { %v4801_v24 = vld [vmem:[%s5088_s2 + $0x3b8] sm:$0xff]  }
 0xc0e   : > { %4473 = vmatpush3.bf16.msra.mxu0 %v4772_v25  ;;  %v2497_v25 = vpack.c.bf16 %v2481_v20, %v2465_v23  ;;  %v2485_v32 = vmax.f32 %v2451_v5, 0.0  ;;  %v2469_v19 = vmax.f32 %v2447_v34, 0.0 }
 0xc0f   : > { %4495 = vmatpush3.bf16.msra.mxu1 %v4773_v27  ;;  %4474 = vmatprep.subr.bf16.mxu0 %v4774_v28  ;;  %v2470_v27 = vmax.f32 %v2449_v12, 0.0  ;;  %v4802_v28 = vld [vmem:[%s5088_s2 + $0x370] sm:$0xff]  }
 0xc10   : > { %4496 = vmatprep.subr.bf16.mxu1 %v4775_v29  ;;  %v2500_v29 = vpack.c.bf16 %v2484_v15, %v2468_v21  ;;  %v2501_v54 = vpack.c.bf16 %v2485_v32, %v2469_v19  ;;  %v4199_v21 = vld [vmem:[%s669_s17] ss:$0 sm:$0xff] }
 0xc12   : > { %4475 = vmatpush3.bf16.msra.mxu0 %v4776_v22  ;;  %v4803_v22 = vld [vmem:[%s5088_s2 + $0x3f0] sm:$0xff]  }
 0xc13   : > { %4497 = vmatpush3.bf16.msra.mxu1 %v4777_v26  ;;  %4476 = vmatprep.subr.bf16.mxu0 %v4778_v30  ;;  %v2502_v26 = vpack.c.bf16 %v2486_v16, %v2470_v27  ;;  %v4804_v30 = vld [vmem:[%s5088_s2 + $0x330] sm:$0xff]  }
 0xc14   : > { %4498 = vmatprep.subr.bf16.mxu1 %v4779_v31  ;;  %v4805_v31 = vld [vmem:[%s5088_s2 + $0x3b0] sm:$0xff]  }
 0xc16   : > { %4477 = vmatpush3.bf16.msra.mxu0 %v4780_v40  ;;  %v4806_v40 = vld [vmem:[%s5088_s2 + $0x368] sm:$0xff]  }
 0xc17   : > { %4499 = vmatpush3.bf16.msra.mxu1 %v4781_v42  ;;  %4478 = vmatprep.subr.bf16.mxu0 %v4782_v43  ;;  %v4807_v42 = vld [vmem:[%s5088_s2 + $0x3e8] sm:$0xff]  }
 0xc18   : > { %4500 = vmatprep.subr.bf16.mxu1 %v4783_v10  ;;  %v4808_v43 = vld [vmem:[%s5088_s2 + $0x328] sm:$0xff]  }
 0xc19   : > { %v4809_v10 = vld [vmem:[%s5088_s2 + $0x3a8] sm:$0xff]  }
 0xc1a   : > { %4479 = vmatpush3.bf16.msra.mxu0 %v4784_v38  ;;  %v4811_v38 = vld [vmem:[%s5088_s2 + $0x3e0] sm:$0xff]  }
 0xc1b   : > { %4501 = vmatpush3.bf16.msra.mxu1 %v4785_v46  ;;  %4480 = vmatprep.subr.bf16.mxu0 %v4786_v47  ;;  %v4813_v46 = vld [vmem:[%s5088_s2 + $0x3a0] sm:$0xff]   ;;  %v4814_v47 = vld [vmem:[%s5088_s2 + $0x358] sm:$0xff]  }
 0xc1c   : > { %4502 = vmatprep.subr.bf16.mxu1 %v4787_v50  ;;  %v4815_v50 = vld [vmem:[%s5088_s2 + $0x3d8] sm:$0xff]  }
 0xc1e   : > { %4481 = vmatpush3.bf16.msra.mxu0 %v4788_v6  ;;  %v4816_v6 = vld [vmem:[%s5088_s2 + $0x318] sm:$0xff]  }
 0xc1f   : > { %4503 = vmatpush3.bf16.msra.mxu1 %v4789_v48  ;;  %4482 = vmatprep.subr.bf16.mxu0 %v4790_v55  ;;  %v4817_v48 = vld [vmem:[%s5088_s2 + $0x398] sm:$0xff]   ;;  %v4818_v55 = vld [vmem:[%s5088_s2 + $0x350] sm:$0xff]  }
 0xc20   : > { %4504 = vmatprep.subr.bf16.mxu1 %v4791_v56  ;;  %v4819_v56 = vld [vmem:[%s5088_s2 + $0x3d0] sm:$0xff]  }
 0xc22   : > { %4483 = vmatpush3.bf16.msra.mxu0 %v4792_v59  ;;  %v4823_v59 = vld [vmem:[%s5088_s2 + $0x3c8] sm:$0xff]  }
 0xc23   : > { %4505 = vmatpush3.bf16.msra.mxu1 %v4793_v2  ;;  %4484 = vmatprep.subr.bf16.mxu0 %v4794_v4  ;;  %v2408_v2 = vadd.f32 %v5477_v51, %v1919_v60  ;;  %v4825_v4 = vld [vmem:[%s5088_s2 + $0x388] sm:$0xff]   ;;  %v2467_v51 = vmax.f32 %v2404_v63, 0.0 }
 0xc24   : > { %4506 = vmatprep.subr.bf16.mxu1 %v4795_v36  ;;  %v4827_v36 = vld [vmem:[%s5088_s2 + $0x3c0] sm:$0xff]  }
 0xc25   : > { %v2483_v13 = vmax.f32 %v2408_v2, 0.0 }
 0xc26   : > { %4485 = vmatpush3.bf16.msra.mxu0 %v4796_v33 }
 0xc27   : > { %4507 = vmatpush3.bf16.msra.mxu1 %v4797_v39  ;;  %4514 = vmatprep.subr.bf16.mxu0 %v4798_v11  ;;  %v2499_v7 = vpack.c.bf16 %v2483_v13, %v2467_v51 }
 0xc28   : > { %4536 = vmatprep.subr.bf16.mxu1 %v4799_v14 }
 0xc29   : > { %3731 = vmatmul.mubr.bf16.vlgmr.msra.gmra.mxu0 %v2495_v18 }
 0xc2a   : > { %3772 = vmatmul.mubr.bf16.vlgmr.msra.gmra.mxu1 %v2497_v25  ;;  %4515 = vmatpush3.bf16.msra.mxu0 %v4800_v17 }
 0xc2b   : > { %3812 = vmatprep.mubr.bf16.mxu0 %v2500_v29  ;;  %4537 = vmatpush3.bf16.msra.mxu1 %v4801_v24 }
 0xc2c   : > { %3853 = vmatprep.mubr.bf16.mxu1 %v2502_v26  ;;  %4516 = vmatprep.subr.bf16.mxu0 %v4802_v28 }
 0xc2d   : > { %4538 = vmatprep.subr.bf16.mxu1 %v4803_v22 }
 0xc2e   : > { %4517 = vmatpush3.bf16.msra.mxu0 %v4804_v30 }
 0xc2f   : > { %4539 = vmatpush3.bf16.msra.mxu1 %v4805_v31  ;;  %4518 = vmatprep.subr.bf16.mxu0 %v4806_v40 }
 0xc30   : > { %4540 = vmatprep.subr.bf16.mxu1 %v4807_v42 }
 0xc32   : > { %4519 = vmatpush3.bf16.msra.mxu0 %v4808_v43 }
 0xc33   : > { %4541 = vmatpush3.bf16.msra.mxu1 %v4809_v10  ;;  %4520 = vmatprep.subr.bf16.mxu0 %v4810_v35 }
 0xc34   : > { %4542 = vmatprep.subr.bf16.mxu1 %v4811_v38 }
 0xc36   : > { %4521 = vmatpush3.bf16.msra.mxu0 %v4812_v45 }
 0xc37   : > { %4543 = vmatpush3.bf16.msra.mxu1 %v4813_v46  ;;  %4522 = vmatprep.subr.bf16.mxu0 %v4814_v47 }
 0xc38   : > { %4544 = vmatprep.subr.bf16.mxu1 %v4815_v50 }
 0xc3a   : > { %4523 = vmatpush3.bf16.msra.mxu0 %v4816_v6 }
 0xc3b   : > { %4545 = vmatpush3.bf16.msra.mxu1 %v4817_v48  ;;  %4524 = vmatprep.subr.bf16.mxu0 %v4818_v55 }
 0xc3c   : > { %4546 = vmatprep.subr.bf16.mxu1 %v4819_v56 }
 0xc3e   : > { %4525 = vmatpush3.bf16.msra.mxu0 %v4820_v1 }
 0xc3f   : > { %4547 = vmatpush3.bf16.msra.mxu1 %v4821_v57  ;;  %4526 = vmatprep.subr.bf16.mxu0 %v4822_v58 }
 0xc40   : > { %4548 = vmatprep.subr.bf16.mxu1 %v4823_v59 }
 0xc42   : > { %4527 = vmatpush3.bf16.msra.mxu0 %v4824_v61 }
 0xc43   : > { %4549 = vmatpush3.bf16.msra.mxu1 %v4825_v4  ;;  %4528 = vmatprep.subr.bf16.mxu0 %v4826_v62 }
 0xc44   : > { %4550 = vmatprep.subr.bf16.mxu1 %v4827_v36 }
 0xc46   : > { %4529 = vmatpush3.bf16.msra.mxu0 %v4828_v0 }
 0xc47   : > { %4551 = vmatpush3.bf16.msra.mxu1 %v4829_v44 }
 0xc49   : > { %3813 = vmatmul.mubr.bf16.vlgmr.msra.gmra.mxu0 %v2499_v7 }
 0xc4a   : > { %3854 = vmatmul.mubr.bf16.vlgmr.msra.gmra.mxu1 %v2501_v54 }
 0xca9   : > { %v4398_v33 = vpop.f32.mrf.mxu0  ;;  %v4420_v37 = vpop.f32.mrf.mxu1 }
 0xcab   : > { %v4399_v41 = vpop.f32.mrf.mxu0  ;;  %v4421_v8 = vpop.f32.mrf.mxu1 }
 0xcac   : > { %v4400_v18 = vadd.f32 %v4399_v41, %v4398_v33  ;;  %v4422_v26 = vadd.f32 %v4421_v8, %v4420_v37 }
 0xcad   : > { %v4401_v9 = vpop.f32.mrf.mxu0  ;;  %v4423_v39 = vpop.f32.mrf.mxu1 }
 0xcae   : > { %v3569_v27 = vadd.f32 %v4400_v18, %v4199_v21 }
 0xcaf   : > { %v4402_v11 = vpop.f32.mrf.mxu0  ;;  %v4424_v12 = vpop.f32.mrf.mxu1 }
 0xcb0   : > { %v4403_v28 = vadd.f32 %v4402_v11, %v4401_v9  ;;  %v3610_v31 = vadd.f32 %v4422_v26, %v3569_v27  ;;  %v4425_v10 = vadd.f32 %v4424_v12, %v4423_v39 }
 0xcb2   : > { %v3572_v40 = vadd.f32 %v4403_v28, %v4199_v21 }
 0xcb4   : > { %v3613_v45 = vadd.f32 %v4425_v10, %v3572_v40 }
 0xcc9   : > { %v4442_v20 = vpop.f32.mrf.mxu0  ;;  %v4464_v14 = vpop.f32.mrf.mxu1 }
 0xccb   : > { %v4443_v3 = vpop.f32.mrf.mxu0  ;;  %v4465_v15 = vpop.f32.mrf.mxu1 }
 0xccc   : > { %v4444_v30 = vadd.f32 %v4443_v3, %v4442_v20  ;;  %v4466_v46 = vadd.f32 %v4465_v15, %v4464_v14 }
 0xccd   : > { %v4445_v23 = vpop.f32.mrf.mxu0  ;;  %v4467_v16 = vpop.f32.mrf.mxu1 }
 0xcce   : > { %v3651_v35 = vadd.f32 %v4444_v30, %v3610_v31  ;;  %v4329_v30 = vld [vmem:[%s5640_s24] ss:$0 sm:$0xff] }
 0xccf   : > { %v4446_v17 = vpop.f32.mrf.mxu0  ;;  %v4468_v25 = vpop.f32.mrf.mxu1 }
 0xcd0   : > { %v4447_v38 = vadd.f32 %v4446_v17, %v4445_v23  ;;  %v3692_v48 = vadd.f32 %v4466_v46, %v3651_v35  ;;  %v4469_v56 = vadd.f32 %v4468_v25, %v4467_v16 }
 0xcd2   : > { %v3654_v55 = vadd.f32 %v4447_v38, %v3613_v45 }
 0xcd4   : > { %v3695_v60 = vadd.f32 %v4469_v56, %v3654_v55 }
 0xce9   : > { %v4486_v24 = vpop.f32.mrf.mxu0 }
 0xcea   : > { %v4508_v29 = vpop.f32.mrf.mxu1 }
 0xceb   : > { %v4487_v22 = vpop.f32.mrf.mxu0 }
 0xcec   : > { %v4509_v42 = vpop.f32.mrf.mxu1  ;;  %v4488_v47 = vadd.f32 %v4487_v22, %v4486_v24  ;;  %v4328_v22 = vld [vmem:[%s5639_s29] ss:$0 sm:$0xff] }
 0xced   : > { %v4489_v43 = vpop.f32.mrf.mxu0  ;;  %v4510_v49 = vadd.f32 %v4509_v42, %v4508_v29 }
 0xcee   : > { %v4511_v50 = vpop.f32.mrf.mxu1  ;;  %v3733_v1 = vadd.f32 %v4488_v47, %v3692_v48 }
 0xcef   : > { %v4490_v6 = vpop.f32.mrf.mxu0 }
 0xcf0   : > { %v4491_v57 = vadd.f32 %v4490_v6, %v4489_v43  ;;  %v4512_v58 = vpop.f32.mrf.mxu1  ;;  %v3774_v4 = vadd.f32 %v4510_v49, %v3733_v1 }
 0xcf1   : > { %v4513_v34 = vadd.f32 %v4512_v58, %v4511_v50 }
 0xcf2   : > { %v3736_v62 = vadd.f32 %v4491_v57, %v3695_v60 }
 0xcf4   : > { %v3777_v51 = vadd.f32 %v4513_v34, %v3736_v62 }
 0xd09   : > { %v4530_v59 = vpop.f32.mrf.mxu0 }
 0xd0a   : > { %v4552_v61 = vpop.f32.mrf.mxu1 }
 0xd0b   : > { %v4531_v2 = vpop.f32.mrf.mxu0 }
 0xd0c   : > { %v4532_v5 = vadd.f32 %v4531_v2, %v4530_v59  ;;  %v4553_v36 = vpop.f32.mrf.mxu1 }
 0xd0d   : > { %v4533_v63 = vpop.f32.mrf.mxu0  ;;  %v4554_v13 = vadd.f32 %v4553_v36, %v4552_v61 }
 0xd0e   : > { %v3815_v0 = vadd.f32 %v4532_v5, %v3774_v4  ;;  %v4555_v44 = vpop.f32.mrf.mxu1 }
 0xd0f   : > { %v4534_v32 = vpop.f32.mrf.mxu0 }
 0xd10   : > { %v3856_v19 = vadd.f32 %v4554_v13, %v3815_v0  ;;  %v4535_v7 = vadd.f32 %v4534_v32, %v4533_v63  ;;  %v4556_v54 = vpop.f32.mrf.mxu1 }
 0xd11   : > { %v4557_v37 = vadd.f32 %v4556_v54, %v4555_v44 }
 0xd12   : > { %v3818_v33 = vadd.f32 %v4535_v7, %v3777_v51  ;;  %v3862_v41 = vadd.f32 %v3856_v19, %v5275_v52 }
 0xd14   : > { %v3859_v8 = vadd.f32 %v4557_v37, %v3818_v33  ;;  %v3864_v9 = vsel %vm713_vm2, %v3862_v41, 0.0 }
 0xd15   : > { %3865 = vadd.xlane.f32.xlu1 %v3864_v9 }
 0xd16   : > { %v3863_v39 = vadd.f32 %v3859_v8, %v5277_v53 }
 0xd18   : > { %v3867_v11 = vsel %vm713_vm2, %v3863_v39, 0.0 }
 0xd19   : > { %3868 = vadd.xlane.f32.xlu0 %v3867_v11 }
 0xd9e   : > { %v3866_v20 = vpop.xlane.xlu1 %3865 }
 0xd9f   : > { %v3870_v12 = vmul.f32 0.03125, %v3866_v20 }
 0xda1   : > { %v3872_v14 = vsub.f32 %v3862_v41, %v3870_v12 }
 0xda2   : > { %v3869_v3 = vpop.xlane.xlu0 %3868 }
 0xda3   : > { %v3871_v15 = vmul.f32 0.03125, %v3869_v3  ;;  %v3874_v23 = vmul.f32 %v3872_v14, %v3872_v14 }
 0xda5   : > { %v3873_v16 = vsub.f32 %v3863_v39, %v3871_v15  ;;  %v3876_v17 = vsel %vm713_vm2, %v3874_v23, 0.0 }
 0xda6   : > { %3877 = vadd.xlane.f32.xlu1 %v3876_v17 }
 0xda7   : > { %v3875_v52 = vmul.f32 %v3873_v16, %v3873_v16 }
 0xda9   : > { %v3879_v18 = vsel %vm713_vm2, %v3875_v52, 0.0 }
 0xdaa   : > { %3880 = vadd.xlane.f32.xlu0 %v3879_v18 }
 0xe2f   : > { %v3878_v53 = vpop.xlane.xlu1 %3877 }
 0xe30   : > { %v3882_v21 = vmul.f32 0.03125, %v3878_v53 }
 0xe32   : > { %v3884_v24 = vadd.f32 1e-05, %v3882_v21 }
 0xe33   : > { %v3881_v25 = vpop.xlane.xlu0 %3880 }
 0xe34   : > { %4866 = vrsqrt.f32 %v3884_v24  ;;  %v3883_v27 = vmul.f32 0.03125, %v3881_v25 }
 0xe36   : > { %v3885_v28 = vadd.f32 1e-05, %v3883_v27 }
 0xe38   : > { %4868 = vrsqrt.f32 %v3885_v28 }
 0xe41   : > { %v4867_v29 = vpop.eup %4866 }
 0xe42   : > { %v3888_v26 = vmul.f32 %v4867_v29, %v3872_v14 }
 0xe44   : > { %v3897_v31 = vmul.f32 %v4328_v22, %v3888_v26 }
 0xe45   : > { %v4869_v40 = vpop.eup %4868 }
 0xe46   : > { %v3906_v42 = vadd.f32 %v4329_v30, %v3897_v31  ;;  %v3889_v43 = vmul.f32 %v4869_v40, %v3873_v16 }
 0xe48   : > { %3908 = vst.msk [vmem:[#allocation2] sm:$0xff] %vm713_vm2, %v3906_v42  ;;  %v3898_v10 = vmul.f32 %v4328_v22, %v3889_v43  ;;  %3913 = sbr.rel (%p4330_p8) target bundleno = 3662 (0xe4e), region = 84 }
 0xe4a   : > { %v3907_v35 = vadd.f32 %v4329_v30, %v3898_v10 }
 0xe4c   : > { %3909 = vst.msk [vmem:[#allocation2 + $0x8] sm:$0xff] %vm713_vm2, %v3907_v35 }
 0xe4d   : > { %3914 = vst.msk [vmem:[%s5097_s25] sm:$0xff] %vm713_vm2, %v3906_v42  ;;  %3915 = vst.msk [vmem:[%s5097_s25 + $0x8] sm:$0xff] %vm713_vm2, %v3907_v35 }
 0xe4e PF: > { %s5642_s20 = sld [smem:[#allocation6_spill]] }
 0xe4f   : > { %s5643_s29 = sld [smem:[#allocation4_spill]] }
 0xe50   : > { %s5644_s30 = sld [smem:[#allocation5_spill]] }
 0xe51   : > { %s5645_s15 = sld [smem:[#allocation7_spill]] }
 0xe52   : > { %s5646_s16 = sld [smem:[#allocation8_spill]] }
 0xe54   : > { %s24_s17 = sadd.s32 1, %s5642_s20  }
 0xe55   : > { %p21_p9 = scmp.ge.s32.totalorder %s24_s17, 6  }
 0xe57   :  { %23 = sbr.rel (!%p21_p9) target bundleno = 7 (0x7), region = 150 }

</bundles_post_ra>
